<compile_context>
chip_gen: v5e
topology: v5e:2x2
jax: 0.10.0
libtpu: 0.0.40
codegen_flags: <defaults>
</compile_context>

<pallas_src>
import functools

import jax
import jax.numpy as jnp
from jax.experimental import pallas as pl
from jax.experimental.pallas import tpu as pltpu

LANE = 128


def _round_up(n, m):
    return ((n + m - 1) // m) * m


def _pad2d(a, rows, cols):
    r, c = a.shape
    return jnp.pad(a, ((0, rows - r), (0, cols - c)))


def _lrelu(x, slope=0.2):
    # nn.LeakyReLU(0.2) per make_actv('leaky_relu') in the spec.
    return jnp.where(x > 0, x, slope * x)


# ----------------------------------------------------------------------------
# Kernel
# ----------------------------------------------------------------------------
def film_kernel(feats_ref, resrc_ref,
                w_s1, b_s1, w_s2, b_s2, w_s3, b_s3,      # stem
                w_f1, b_f1, w_f2, b_f2, w_f3, b_f3,      # film (fused 4*hid head)
                w_c1, b_c1, w_c2, b_c2,                  # fc1, fc2
                w_o, b_o,                                # out_fc
                out_ref):
    def lin(x_bf16, w_ref, b_ref):
        # bf16 x bf16 -> f32 accumulation on the MXU; bias stays f32.
        return jnp.dot(x_bf16, w_ref[...],
                       preferred_element_type=jnp.float32) + b_ref[...]

    def lin_act(x_bf16, w_ref, b_ref):
        # Linear -> LeakyReLU(0.2); keep the result in bf16 (halves live
        # activation bytes; the next dot would cast to bf16 anyway).
        return _lrelu(lin(x_bf16, w_ref, b_ref)).astype(jnp.bfloat16)

    # stem(feats): 3 x (Linear + LeakyReLU)
    x = feats_ref[...]                         # bf16 (tb, feats_dim_p)
    x = lin_act(x, w_s1, b_s1)
    x = lin_act(x, w_s2, b_s2)
    x = lin_act(x, w_s3, b_s3)                 # bf16 (tb, hid_p)

    # film(resrc): 2 x (Linear + LeakyReLU), then one fused 4*hid head.
    h = resrc_ref[...]
    h = lin_act(h, w_f1, b_f1)
    h = lin_act(h, w_f2, b_f2)

    gb = lin(h, w_f3, b_f3)                    # f32 (tb, 4*hid_p), one MXU dot
    hid = x.shape[-1]                          # hid_p, multiple of 128
    g1 = gb[:, 0 * hid:1 * hid]                # lane-aligned static slices
    b1 = gb[:, 1 * hid:2 * hid]
    g2 = gb[:, 2 * hid:3 * hid]
    b2 = gb[:, 3 * hid:4 * hid]

    # FiLM modulation (f32 fma) + fc1 / fc2
    x = lin_act((g1 * x + b1).astype(jnp.bfloat16), w_c1, b_c1)
    x = lin_act((g2 * x + b2).astype(jnp.bfloat16), w_c2, b_c2)

    # out_fc
    out_ref[...] = lin(x, w_o, b_o).astype(out_ref.dtype)


# ----------------------------------------------------------------------------
# Host-side weight preparation (do once, reuse across calls)
# ----------------------------------------------------------------------------
def prepare_film_params(params, weight_dtype=jnp.bfloat16):
    """Pad every feature dim to a multiple of 128 lanes (zero padding is a
    no-op through Linear + LeakyReLU + FiLM).  The film head stays ONE fused
    [film_dim_p, 4*hid_p] matrix, but its four hid-sized column chunks are
    re-packed so chunk k lives at columns [k*hid_p, (k+1)*hid_p)."""
    hid = params["w_s1"].shape[1]
    hid_p = _round_up(hid, LANE)

    def padw(w):
        r, c = w.shape
        return _pad2d(w, _round_up(r, LANE), _round_up(c, LANE)).astype(weight_dtype)

    def padb(b):
        b = b.reshape(1, -1)
        return _pad2d(b, 1, _round_up(b.shape[1], LANE)).astype(jnp.float32)

    w_f3 = params["w_f3"]
    b_f3 = params["b_f3"].reshape(1, -1)
    film_rows_p = _round_up(w_f3.shape[0], LANE)
    # Re-pack chunk boundaries (g1|b1|g2|b2) to hid_p before fusing.
    w_chunks = [_pad2d(w_f3[:, j * hid:(j + 1) * hid], film_rows_p, hid_p)
                for j in range(4)]
    b_chunks = [_pad2d(b_f3[:, j * hid:(j + 1) * hid], 1, hid_p)
                for j in range(4)]
    w_f3_p = jnp.concatenate(w_chunks, axis=1).astype(weight_dtype)
    b_f3_p = jnp.concatenate(b_chunks, axis=1).astype(jnp.float32)

    return (
        padw(params["w_s1"]), padb(params["b_s1"]),
        padw(params["w_s2"]), padb(params["b_s2"]),
        padw(params["w_s3"]), padb(params["b_s3"]),
        padw(params["w_f1"]), padb(params["b_f1"]),
        padw(params["w_f2"]), padb(params["b_f2"]),
        w_f3_p, b_f3_p,
        padw(params["w_c1"]), padb(params["b_c1"]),
        padw(params["w_c2"]), padb(params["b_c2"]),
        padw(params["w_o"]), padb(params["b_o"]),
    )


# ----------------------------------------------------------------------------
# Wrapper (jitted; padding + output slice fuse with the pallas_call)
# ----------------------------------------------------------------------------
@functools.partial(
    jax.jit,
    static_argnames=("out_dim", "batch_tile", "out_dtype", "single_buffer_weights"))
def film_forward(feats, resrc, weights, *, out_dim, batch_tile=512,
                 out_dtype=jnp.float32, single_buffer_weights=True):
    assert batch_tile % 16 == 0, "batch_tile must be a multiple of 16 (bf16 rows)"
    B = feats.shape[0]

    # --- batch tiling -------------------------------------------------------
    tb = min(batch_tile, _round_up(B, 16))
    if tb >= B and B > 16:
        # Ensure >= 2 grid steps so the "parallel" axis can shard across the
        # two TensorCores on v7x.
        tb = _round_up(pl.cdiv(B, 2), 16)
    Bp = pl.cdiv(B, tb) * tb
    grid = (Bp // tb,)

    # --- padded dims (derived from the already-prepared weights) ------------
    feats_dim_p = weights[0].shape[0]          # w_s1 rows
    resrc_dim_p = weights[6].shape[0]          # w_f1 rows
    hid_p = weights[0].shape[1]                # w_s1 cols
    out_dim_p = weights[-2].shape[1]           # w_o cols

    feats_p = _pad2d(feats, Bp, feats_dim_p).astype(jnp.bfloat16)
    resrc_p = _pad2d(resrc, Bp, resrc_dim_p).astype(jnp.bfloat16)

    batch_map = lambda i: (i, 0)
    full_map = lambda i: (0, 0)

    def weight_spec(shape):
        if single_buffer_weights:
            # Constant block index -> nothing to prefetch; keep one buffer.
            return pl.BlockSpec(shape, full_map, pipeline_mode=pl.Buffered(1))
        return pl.BlockSpec(shape, full_map)

    in_specs = [
        pl.BlockSpec((tb, feats_dim_p), batch_map),
        pl.BlockSpec((tb, resrc_dim_p), batch_map),
    ] + [weight_spec(w.shape) for w in weights]
    out_spec = pl.BlockSpec((tb, out_dim_p), batch_map)

    # --- VMEM budget: 2x I/O tiles, 1x weights, live activations ------------
    weight_bytes = sum(int(a.size) * a.dtype.itemsize for a in weights)
    wbuf = 1 if single_buffer_weights else 2
    est = (2 * tb * feats_dim_p * 2
           + 2 * tb * resrc_dim_p * 2
           + 2 * tb * out_dim_p * jnp.dtype(out_dtype).itemsize
           + wbuf * weight_bytes
           + 32 * tb * hid_p)                  # bf16 x/h + f32 fused film head
    try:
        phys_vmem = pltpu.get_tpu_info().vmem_capacity_bytes
    except Exception:
        phys_vmem = 64 * 1024 * 1024           # conservative (v7x per-TC)
    cap = phys_vmem * 3 // 4                   # headroom for Mosaic scratch
    vmem_limit = int(min(max(est * 3 // 2, 32 * 1024 * 1024), cap))

    out_padded = pl.pallas_call(
        film_kernel,
        out_shape=jax.ShapeDtypeStruct((Bp, out_dim_p), out_dtype),
        grid=grid,
        in_specs=in_specs,
        out_specs=out_spec,
        compiler_params=pltpu.CompilerParams(
            dimension_semantics=("parallel",),
            vmem_limit_bytes=vmem_limit),
    )(feats_p, resrc_p, *weights)

    return out_padded[:B, :out_dim]


# ----------------------------------------------------------------------------
# Reference + synthetic params
# ----------------------------------------------------------------------------
def init_params(key, feats_dim, resrc_dim, hid_dim, film_dim, out_dim):
    """Deterministic synthetic parameters (weights stored [in, out], f32)."""
    shapes = {
        "w_s1": (feats_dim, hid_dim), "b_s1": (1, hid_dim),
        "w_s2": (hid_dim, hid_dim),   "b_s2": (1, hid_dim),
        "w_s3": (hid_dim, hid_dim),   "b_s3": (1, hid_dim),
        "w_f1": (resrc_dim, film_dim), "b_f1": (1, film_dim),
        "w_f2": (film_dim, film_dim),  "b_f2": (1, film_dim),
        "w_f3": (film_dim, hid_dim * 4), "b_f3": (1, hid_dim * 4),
        "w_c1": (hid_dim, hid_dim),   "b_c1": (1, hid_dim),
        "w_c2": (hid_dim, hid_dim),   "b_c2": (1, hid_dim),
        "w_o": (hid_dim, out_dim),    "b_o": (1, out_dim),
    }
    params = {}
    keys = jax.random.split(key, len(shapes))
    for k, (name, shape) in zip(keys, sorted(shapes.items())):
        params[name] = (0.1 * jax.random.normal(k, shape)).astype(jnp.float32)
    return params


def film_reference(feats, resrc, p, weight_dtype=jnp.bfloat16):
    """Pure-JAX reference mirroring the PyTorch forward and the kernel's
    numerics (bf16 weights/activations, f32 accumulation, f32 FiLM fma)."""
    def lin(x, w, b):
        return jnp.dot(x.astype(weight_dtype), w.astype(weight_dtype),
                       preferred_element_type=jnp.float32) + b.astype(jnp.float32)

    def lin_act(x, w, b):
        return _lrelu(lin(x, w, b)).astype(weight_dtype)

    x = lin_act(feats, p["w_s1"], p["b_s1"])
    x = lin_act(x, p["w_s2"], p["b_s2"])
    x = lin_act(x, p["w_s3"], p["b_s3"])
    h = lin_act(resrc, p["w_f1"], p["b_f1"])
    h = lin_act(h, p["w_f2"], p["b_f2"])
    gb = lin(h, p["w_f3"], p["b_f3"])
    H = x.shape[-1]
    g1, b1, g2, b2 = gb[:, :H], gb[:, H:2 * H], gb[:, 2 * H:3 * H], gb[:, 3 * H:]
    x = lin_act(g1 * x + b1, p["w_c1"], p["b_c1"])
    x = lin_act(g2 * x + b2, p["w_c2"], p["b_c2"])
    return lin(x, p["w_o"], p["b_o"])


if __name__ == "__main__":
    # Small shapes consistent with the module's forward.  B=40 with
    # batch_tile=16 exercises the multi-step "parallel" grid and the
    # ragged-batch padding path.
    B, feats_dim, resrc_dim, hid_dim, film_dim, out_dim = 40, 16, 8, 32, 32, 8

    key = jax.random.PRNGKey(0)
    k_f, k_r, k_p = jax.random.split(key, 3)
    feats = jax.random.normal(k_f, (B, feats_dim), dtype=jnp.float32)
    resrc = jax.random.normal(k_r, (B, resrc_dim), dtype=jnp.float32)
    params = init_params(k_p, feats_dim, resrc_dim, hid_dim, film_dim, out_dim)

    # Pad / fuse / cast the weights once; reuse across all calls.
    weights = prepare_film_params(params)

    run = functools.partial(film_forward, out_dim=out_dim, batch_tile=16)
    try:
        out = jax.block_until_ready(run(feats, resrc, weights))
    except Exception:
        # Fallback for JAX builds that reject single-buffered weight specs.
        out = jax.block_until_ready(
            run(feats, resrc, weights, single_buffer_weights=False))

    ref = film_reference(feats, resrc, params)
    assert out.shape == (B, out_dim)
    assert jnp.allclose(out, ref, atol=2e-2, rtol=2e-2), (
        float(jnp.max(jnp.abs(out - ref))))

    print("KERNEL_OK")
</pallas_src>

<mosaic_0001>
module attributes {stable_mosaic.version = 11 : i64} {
  func.func @film_kernel(%arg0: i32, %arg1: memref<16x128xbf16, #tpu.memory_space<vmem>>, %arg2: memref<16x128xbf16, #tpu.memory_space<vmem>>, %arg3: memref<128x128xbf16, #tpu.memory_space<vmem>>, %arg4: memref<1x128xf32, #tpu.memory_space<vmem>>, %arg5: memref<128x128xbf16, #tpu.memory_space<vmem>>, %arg6: memref<1x128xf32, #tpu.memory_space<vmem>>, %arg7: memref<128x128xbf16, #tpu.memory_space<vmem>>, %arg8: memref<1x128xf32, #tpu.memory_space<vmem>>, %arg9: memref<128x128xbf16, #tpu.memory_space<vmem>>, %arg10: memref<1x128xf32, #tpu.memory_space<vmem>>, %arg11: memref<128x128xbf16, #tpu.memory_space<vmem>>, %arg12: memref<1x128xf32, #tpu.memory_space<vmem>>, %arg13: memref<128x512xbf16, #tpu.memory_space<vmem>>, %arg14: memref<1x512xf32, #tpu.memory_space<vmem>>, %arg15: memref<128x128xbf16, #tpu.memory_space<vmem>>, %arg16: memref<1x128xf32, #tpu.memory_space<vmem>>, %arg17: memref<128x128xbf16, #tpu.memory_space<vmem>>, %arg18: memref<1x128xf32, #tpu.memory_space<vmem>>, %arg19: memref<128x128xbf16, #tpu.memory_space<vmem>>, %arg20: memref<1x128xf32, #tpu.memory_space<vmem>>, %arg21: memref<16x128xf32, #tpu.memory_space<vmem>>) attributes {dimension_semantics = [#tpu.dimension_semantics<parallel>], iteration_bounds = array<i64: 3>, scalar_prefetch = 0 : i64, scratch_operands = 0 : i64, tpu.core_type = #tpu.core_type<tc>, window_params = [{transform_indices = @transform_0, window_bounds = array<i64: 16, 128>}, {transform_indices = @transform_1, window_bounds = array<i64: 16, 128>}, {pipeline_mode = #tpu.pipeline_mode<synchronous>, transform_indices = @transform_2, window_bounds = array<i64: 128, 128>}, {pipeline_mode = #tpu.pipeline_mode<synchronous>, transform_indices = @transform_3, window_bounds = array<i64: 1, 128>}, {pipeline_mode = #tpu.pipeline_mode<synchronous>, transform_indices = @transform_4, window_bounds = array<i64: 128, 128>}, {pipeline_mode = #tpu.pipeline_mode<synchronous>, transform_indices = @transform_5, window_bounds = array<i64: 1, 128>}, {pipeline_mode = #tpu.pipeline_mode<synchronous>, transform_indices = @transform_6, window_bounds = array<i64: 128, 128>}, {pipeline_mode = #tpu.pipeline_mode<synchronous>, transform_indices = @transform_7, window_bounds = array<i64: 1, 128>}, {pipeline_mode = #tpu.pipeline_mode<synchronous>, transform_indices = @transform_8, window_bounds = array<i64: 128, 128>}, {pipeline_mode = #tpu.pipeline_mode<synchronous>, transform_indices = @transform_9, window_bounds = array<i64: 1, 128>}, {pipeline_mode = #tpu.pipeline_mode<synchronous>, transform_indices = @transform_10, window_bounds = array<i64: 128, 128>}, {pipeline_mode = #tpu.pipeline_mode<synchronous>, transform_indices = @transform_11, window_bounds = array<i64: 1, 128>}, {pipeline_mode = #tpu.pipeline_mode<synchronous>, transform_indices = @transform_12, window_bounds = array<i64: 128, 512>}, {pipeline_mode = #tpu.pipeline_mode<synchronous>, transform_indices = @transform_13, window_bounds = array<i64: 1, 512>}, {pipeline_mode = #tpu.pipeline_mode<synchronous>, transform_indices = @transform_14, window_bounds = array<i64: 128, 128>}, {pipeline_mode = #tpu.pipeline_mode<synchronous>, transform_indices = @transform_15, window_bounds = array<i64: 1, 128>}, {pipeline_mode = #tpu.pipeline_mode<synchronous>, transform_indices = @transform_16, window_bounds = array<i64: 128, 128>}, {pipeline_mode = #tpu.pipeline_mode<synchronous>, transform_indices = @transform_17, window_bounds = array<i64: 1, 128>}, {pipeline_mode = #tpu.pipeline_mode<synchronous>, transform_indices = @transform_18, window_bounds = array<i64: 128, 128>}, {pipeline_mode = #tpu.pipeline_mode<synchronous>, transform_indices = @transform_19, window_bounds = array<i64: 1, 128>}, {transform_indices = @transform_20, window_bounds = array<i64: 16, 128>}]} {
    %c0 = arith.constant 0 : index
    %c0_0 = arith.constant 0 : index
    %0 = vector.load %arg1[%c0, %c0_0] : memref<16x128xbf16, #tpu.memory_space<vmem>>, vector<16x128xbf16>
    %c0_1 = arith.constant 0 : index
    %c0_2 = arith.constant 0 : index
    %1 = vector.load %arg3[%c0_1, %c0_2] : memref<128x128xbf16, #tpu.memory_space<vmem>>, vector<128x128xbf16>
    %cst = arith.constant dense<0.000000e+00> : vector<16x128xf32>
    %2 = tpu.matmul %0, %1, %cst {dimension_numbers = #tpu.dot_dimension_numbers<[1], [0], [0], [1], [0, 0, 1, 1], [], []>} : vector<16x128xbf16>, vector<128x128xbf16>, vector<16x128xf32> -> vector<16x128xf32>
    %c0_3 = arith.constant 0 : index
    %c0_4 = arith.constant 0 : index
    %3 = vector.load %arg4[%c0_3, %c0_4] : memref<1x128xf32, #tpu.memory_space<vmem>>, vector<1x128xf32>
    %4 = vector.broadcast %3 : vector<1x128xf32> to vector<16x128xf32>
    %5 = arith.addf %2, %4 : vector<16x128xf32>
    %cst_5 = arith.constant 0.000000e+00 : f32
    %6 = vector.broadcast %cst_5 : f32 to vector<16x128xf32>
    %7 = arith.cmpf ogt, %5, %6 : vector<16x128xf32>
    %cst_6 = arith.constant 2.000000e-01 : f32
    %8 = vector.broadcast %cst_6 : f32 to vector<16x128xf32>
    %9 = arith.mulf %8, %5 : vector<16x128xf32>
    %10 = arith.select %7, %5, %9 : vector<16x128xi1>, vector<16x128xf32>
    %11 = arith.truncf %10 : vector<16x128xf32> to vector<16x128xbf16>
    %c0_7 = arith.constant 0 : index
    %c0_8 = arith.constant 0 : index
    %12 = vector.load %arg5[%c0_7, %c0_8] : memref<128x128xbf16, #tpu.memory_space<vmem>>, vector<128x128xbf16>
    %cst_9 = arith.constant dense<0.000000e+00> : vector<16x128xf32>
    %13 = tpu.matmul %11, %12, %cst_9 {dimension_numbers = #tpu.dot_dimension_numbers<[1], [0], [0], [1], [0, 0, 1, 1], [], []>} : vector<16x128xbf16>, vector<128x128xbf16>, vector<16x128xf32> -> vector<16x128xf32>
    %c0_10 = arith.constant 0 : index
    %c0_11 = arith.constant 0 : index
    %14 = vector.load %arg6[%c0_10, %c0_11] : memref<1x128xf32, #tpu.memory_space<vmem>>, vector<1x128xf32>
    %15 = vector.broadcast %14 : vector<1x128xf32> to vector<16x128xf32>
    %16 = arith.addf %13, %15 : vector<16x128xf32>
    %cst_12 = arith.constant 0.000000e+00 : f32
    %17 = vector.broadcast %cst_12 : f32 to vector<16x128xf32>
    %18 = arith.cmpf ogt, %16, %17 : vector<16x128xf32>
    %cst_13 = arith.constant 2.000000e-01 : f32
    %19 = vector.broadcast %cst_13 : f32 to vector<16x128xf32>
    %20 = arith.mulf %19, %16 : vector<16x128xf32>
    %21 = arith.select %18, %16, %20 : vector<16x128xi1>, vector<16x128xf32>
    %22 = arith.truncf %21 : vector<16x128xf32> to vector<16x128xbf16>
    %c0_14 = arith.constant 0 : index
    %c0_15 = arith.constant 0 : index
    %23 = vector.load %arg7[%c0_14, %c0_15] : memref<128x128xbf16, #tpu.memory_space<vmem>>, vector<128x128xbf16>
    %cst_16 = arith.constant dense<0.000000e+00> : vector<16x128xf32>
    %24 = tpu.matmul %22, %23, %cst_16 {dimension_numbers = #tpu.dot_dimension_numbers<[1], [0], [0], [1], [0, 0, 1, 1], [], []>} : vector<16x128xbf16>, vector<128x128xbf16>, vector<16x128xf32> -> vector<16x128xf32>
    %c0_17 = arith.constant 0 : index
    %c0_18 = arith.constant 0 : index
    %25 = vector.load %arg8[%c0_17, %c0_18] : memref<1x128xf32, #tpu.memory_space<vmem>>, vector<1x128xf32>
    %26 = vector.broadcast %25 : vector<1x128xf32> to vector<16x128xf32>
    %27 = arith.addf %24, %26 : vector<16x128xf32>
    %cst_19 = arith.constant 0.000000e+00 : f32
    %28 = vector.broadcast %cst_19 : f32 to vector<16x128xf32>
    %29 = arith.cmpf ogt, %27, %28 : vector<16x128xf32>
    %cst_20 = arith.constant 2.000000e-01 : f32
    %30 = vector.broadcast %cst_20 : f32 to vector<16x128xf32>
    %31 = arith.mulf %30, %27 : vector<16x128xf32>
    %32 = arith.select %29, %27, %31 : vector<16x128xi1>, vector<16x128xf32>
    %33 = arith.truncf %32 : vector<16x128xf32> to vector<16x128xbf16>
    %c0_21 = arith.constant 0 : index
    %c0_22 = arith.constant 0 : index
    %34 = vector.load %arg2[%c0_21, %c0_22] : memref<16x128xbf16, #tpu.memory_space<vmem>>, vector<16x128xbf16>
    %c0_23 = arith.constant 0 : index
    %c0_24 = arith.constant 0 : index
    %35 = vector.load %arg9[%c0_23, %c0_24] : memref<128x128xbf16, #tpu.memory_space<vmem>>, vector<128x128xbf16>
    %cst_25 = arith.constant dense<0.000000e+00> : vector<16x128xf32>
    %36 = tpu.matmul %34, %35, %cst_25 {dimension_numbers = #tpu.dot_dimension_numbers<[1], [0], [0], [1], [0, 0, 1, 1], [], []>} : vector<16x128xbf16>, vector<128x128xbf16>, vector<16x128xf32> -> vector<16x128xf32>
    %c0_26 = arith.constant 0 : index
    %c0_27 = arith.constant 0 : index
    %37 = vector.load %arg10[%c0_26, %c0_27] : memref<1x128xf32, #tpu.memory_space<vmem>>, vector<1x128xf32>
    %38 = vector.broadcast %37 : vector<1x128xf32> to vector<16x128xf32>
    %39 = arith.addf %36, %38 : vector<16x128xf32>
    %cst_28 = arith.constant 0.000000e+00 : f32
    %40 = vector.broadcast %cst_28 : f32 to vector<16x128xf32>
    %41 = arith.cmpf ogt, %39, %40 : vector<16x128xf32>
    %cst_29 = arith.constant 2.000000e-01 : f32
    %42 = vector.broadcast %cst_29 : f32 to vector<16x128xf32>
    %43 = arith.mulf %42, %39 : vector<16x128xf32>
    %44 = arith.select %41, %39, %43 : vector<16x128xi1>, vector<16x128xf32>
    %45 = arith.truncf %44 : vector<16x128xf32> to vector<16x128xbf16>
    %c0_30 = arith.constant 0 : index
    %c0_31 = arith.constant 0 : index
    %46 = vector.load %arg11[%c0_30, %c0_31] : memref<128x128xbf16, #tpu.memory_space<vmem>>, vector<128x128xbf16>
    %cst_32 = arith.constant dense<0.000000e+00> : vector<16x128xf32>
    %47 = tpu.matmul %45, %46, %cst_32 {dimension_numbers = #tpu.dot_dimension_numbers<[1], [0], [0], [1], [0, 0, 1, 1], [], []>} : vector<16x128xbf16>, vector<128x128xbf16>, vector<16x128xf32> -> vector<16x128xf32>
    %c0_33 = arith.constant 0 : index
    %c0_34 = arith.constant 0 : index
    %48 = vector.load %arg12[%c0_33, %c0_34] : memref<1x128xf32, #tpu.memory_space<vmem>>, vector<1x128xf32>
    %49 = vector.broadcast %48 : vector<1x128xf32> to vector<16x128xf32>
    %50 = arith.addf %47, %49 : vector<16x128xf32>
    %cst_35 = arith.constant 0.000000e+00 : f32
    %51 = vector.broadcast %cst_35 : f32 to vector<16x128xf32>
    %52 = arith.cmpf ogt, %50, %51 : vector<16x128xf32>
    %cst_36 = arith.constant 2.000000e-01 : f32
    %53 = vector.broadcast %cst_36 : f32 to vector<16x128xf32>
    %54 = arith.mulf %53, %50 : vector<16x128xf32>
    %55 = arith.select %52, %50, %54 : vector<16x128xi1>, vector<16x128xf32>
    %56 = arith.truncf %55 : vector<16x128xf32> to vector<16x128xbf16>
    %c0_37 = arith.constant 0 : index
    %c0_38 = arith.constant 0 : index
    %57 = vector.load %arg13[%c0_37, %c0_38] : memref<128x512xbf16, #tpu.memory_space<vmem>>, vector<128x512xbf16>
    %cst_39 = arith.constant dense<0.000000e+00> : vector<16x512xf32>
    %58 = tpu.matmul %56, %57, %cst_39 {dimension_numbers = #tpu.dot_dimension_numbers<[1], [0], [0], [1], [0, 0, 1, 1], [], []>} : vector<16x128xbf16>, vector<128x512xbf16>, vector<16x512xf32> -> vector<16x512xf32>
    %c0_40 = arith.constant 0 : index
    %c0_41 = arith.constant 0 : index
    %59 = vector.load %arg14[%c0_40, %c0_41] : memref<1x512xf32, #tpu.memory_space<vmem>>, vector<1x512xf32>
    %60 = vector.broadcast %59 : vector<1x512xf32> to vector<16x512xf32>
    %61 = arith.addf %58, %60 : vector<16x512xf32>
    %62 = vector.extract_strided_slice %61 {offsets = [0, 0], sizes = [16, 128], strides = [1, 1]} : vector<16x512xf32> to vector<16x128xf32>
    %63 = vector.extract_strided_slice %61 {offsets = [0, 128], sizes = [16, 128], strides = [1, 1]} : vector<16x512xf32> to vector<16x128xf32>
    %64 = vector.extract_strided_slice %61 {offsets = [0, 256], sizes = [16, 128], strides = [1, 1]} : vector<16x512xf32> to vector<16x128xf32>
    %65 = vector.extract_strided_slice %61 {offsets = [0, 384], sizes = [16, 128], strides = [1, 1]} : vector<16x512xf32> to vector<16x128xf32>
    %66 = arith.extf %33 : vector<16x128xbf16> to vector<16x128xf32>
    %67 = arith.mulf %62, %66 : vector<16x128xf32>
    %68 = arith.addf %67, %63 : vector<16x128xf32>
    %69 = arith.truncf %68 : vector<16x128xf32> to vector<16x128xbf16>
    %c0_42 = arith.constant 0 : index
    %c0_43 = arith.constant 0 : index
    %70 = vector.load %arg15[%c0_42, %c0_43] : memref<128x128xbf16, #tpu.memory_space<vmem>>, vector<128x128xbf16>
    %cst_44 = arith.constant dense<0.000000e+00> : vector<16x128xf32>
    %71 = tpu.matmul %69, %70, %cst_44 {dimension_numbers = #tpu.dot_dimension_numbers<[1], [0], [0], [1], [0, 0, 1, 1], [], []>} : vector<16x128xbf16>, vector<128x128xbf16>, vector<16x128xf32> -> vector<16x128xf32>
    %c0_45 = arith.constant 0 : index
    %c0_46 = arith.constant 0 : index
    %72 = vector.load %arg16[%c0_45, %c0_46] : memref<1x128xf32, #tpu.memory_space<vmem>>, vector<1x128xf32>
    %73 = vector.broadcast %72 : vector<1x128xf32> to vector<16x128xf32>
    %74 = arith.addf %71, %73 : vector<16x128xf32>
    %cst_47 = arith.constant 0.000000e+00 : f32
    %75 = vector.broadcast %cst_47 : f32 to vector<16x128xf32>
    %76 = arith.cmpf ogt, %74, %75 : vector<16x128xf32>
    %cst_48 = arith.constant 2.000000e-01 : f32
    %77 = vector.broadcast %cst_48 : f32 to vector<16x128xf32>
    %78 = arith.mulf %77, %74 : vector<16x128xf32>
    %79 = arith.select %76, %74, %78 : vector<16x128xi1>, vector<16x128xf32>
    %80 = arith.truncf %79 : vector<16x128xf32> to vector<16x128xbf16>
    %81 = arith.extf %80 : vector<16x128xbf16> to vector<16x128xf32>
    %82 = arith.mulf %64, %81 : vector<16x128xf32>
    %83 = arith.addf %82, %65 : vector<16x128xf32>
    %84 = arith.truncf %83 : vector<16x128xf32> to vector<16x128xbf16>
    %c0_49 = arith.constant 0 : index
    %c0_50 = arith.constant 0 : index
    %85 = vector.load %arg17[%c0_49, %c0_50] : memref<128x128xbf16, #tpu.memory_space<vmem>>, vector<128x128xbf16>
    %cst_51 = arith.constant dense<0.000000e+00> : vector<16x128xf32>
    %86 = tpu.matmul %84, %85, %cst_51 {dimension_numbers = #tpu.dot_dimension_numbers<[1], [0], [0], [1], [0, 0, 1, 1], [], []>} : vector<16x128xbf16>, vector<128x128xbf16>, vector<16x128xf32> -> vector<16x128xf32>
    %c0_52 = arith.constant 0 : index
    %c0_53 = arith.constant 0 : index
    %87 = vector.load %arg18[%c0_52, %c0_53] : memref<1x128xf32, #tpu.memory_space<vmem>>, vector<1x128xf32>
    %88 = vector.broadcast %87 : vector<1x128xf32> to vector<16x128xf32>
    %89 = arith.addf %86, %88 : vector<16x128xf32>
    %cst_54 = arith.constant 0.000000e+00 : f32
    %90 = vector.broadcast %cst_54 : f32 to vector<16x128xf32>
    %91 = arith.cmpf ogt, %89, %90 : vector<16x128xf32>
    %cst_55 = arith.constant 2.000000e-01 : f32
    %92 = vector.broadcast %cst_55 : f32 to vector<16x128xf32>
    %93 = arith.mulf %92, %89 : vector<16x128xf32>
    %94 = arith.select %91, %89, %93 : vector<16x128xi1>, vector<16x128xf32>
    %95 = arith.truncf %94 : vector<16x128xf32> to vector<16x128xbf16>
    %c0_56 = arith.constant 0 : index
    %c0_57 = arith.constant 0 : index
    %96 = vector.load %arg19[%c0_56, %c0_57] : memref<128x128xbf16, #tpu.memory_space<vmem>>, vector<128x128xbf16>
    %cst_58 = arith.constant dense<0.000000e+00> : vector<16x128xf32>
    %97 = tpu.matmul %95, %96, %cst_58 {dimension_numbers = #tpu.dot_dimension_numbers<[1], [0], [0], [1], [0, 0, 1, 1], [], []>} : vector<16x128xbf16>, vector<128x128xbf16>, vector<16x128xf32> -> vector<16x128xf32>
    %c0_59 = arith.constant 0 : index
    %c0_60 = arith.constant 0 : index
    %98 = vector.load %arg20[%c0_59, %c0_60] : memref<1x128xf32, #tpu.memory_space<vmem>>, vector<1x128xf32>
    %99 = vector.broadcast %98 : vector<1x128xf32> to vector<16x128xf32>
    %100 = arith.addf %97, %99 : vector<16x128xf32>
    %c0_61 = arith.constant 0 : index
    %c0_62 = arith.constant 0 : index
    %101 = vector.load %arg21[%c0_61, %c0_62] : memref<16x128xf32, #tpu.memory_space<vmem>>, vector<16x128xf32>
    tpu.vector_store %arg21[%c0_61, %c0_62], %100 {strides = array<i32>} : memref<16x128xf32, #tpu.memory_space<vmem>>, vector<16x128xf32>,
    return
  }
  func.func @transform_0(%arg0: i32) -> (i32, i32) {
    %c0_i32 = arith.constant 0 : i32
    %c0_i32_0 = arith.constant 0 : i32
    return %arg0, %c0_i32 : i32, i32
  }
  func.func @transform_1(%arg0: i32) -> (i32, i32) {
    %c0_i32 = arith.constant 0 : i32
    %c0_i32_0 = arith.constant 0 : i32
    return %arg0, %c0_i32 : i32, i32
  }
  func.func @transform_2(%arg0: i32) -> (i32, i32) {
    %c0_i32 = arith.constant 0 : i32
    %c0_i32_0 = arith.constant 0 : i32
    %c0_i32_1 = arith.constant 0 : i32
    return %c0_i32, %c0_i32_0 : i32, i32
  }
  func.func @transform_3(%arg0: i32) -> (i32, i32) {
    %c0_i32 = arith.constant 0 : i32
    %c0_i32_0 = arith.constant 0 : i32
    %c0_i32_1 = arith.constant 0 : i32
    return %c0_i32, %c0_i32_0 : i32, i32
  }
  func.func @transform_4(%arg0: i32) -> (i32, i32) {
    %c0_i32 = arith.constant 0 : i32
    %c0_i32_0 = arith.constant 0 : i32
    %c0_i32_1 = arith.constant 0 : i32
    return %c0_i32, %c0_i32_0 : i32, i32
  }
  func.func @transform_5(%arg0: i32) -> (i32, i32) {
    %c0_i32 = arith.constant 0 : i32
    %c0_i32_0 = arith.constant 0 : i32
    %c0_i32_1 = arith.constant 0 : i32
    return %c0_i32, %c0_i32_0 : i32, i32
  }
  func.func @transform_6(%arg0: i32) -> (i32, i32) {
    %c0_i32 = arith.constant 0 : i32
    %c0_i32_0 = arith.constant 0 : i32
    %c0_i32_1 = arith.constant 0 : i32
    return %c0_i32, %c0_i32_0 : i32, i32
  }
  func.func @transform_7(%arg0: i32) -> (i32, i32) {
    %c0_i32 = arith.constant 0 : i32
    %c0_i32_0 = arith.constant 0 : i32
    %c0_i32_1 = arith.constant 0 : i32
    return %c0_i32, %c0_i32_0 : i32, i32
  }
  func.func @transform_8(%arg0: i32) -> (i32, i32) {
    %c0_i32 = arith.constant 0 : i32
    %c0_i32_0 = arith.constant 0 : i32
    %c0_i32_1 = arith.constant 0 : i32
    return %c0_i32, %c0_i32_0 : i32, i32
  }
  func.func @transform_9(%arg0: i32) -> (i32, i32) {
    %c0_i32 = arith.constant 0 : i32
    %c0_i32_0 = arith.constant 0 : i32
    %c0_i32_1 = arith.constant 0 : i32
    return %c0_i32, %c0_i32_0 : i32, i32
  }
  func.func @transform_10(%arg0: i32) -> (i32, i32) {
    %c0_i32 = arith.constant 0 : i32
    %c0_i32_0 = arith.constant 0 : i32
    %c0_i32_1 = arith.constant 0 : i32
    return %c0_i32, %c0_i32_0 : i32, i32
  }
  func.func @transform_11(%arg0: i32) -> (i32, i32) {
    %c0_i32 = arith.constant 0 : i32
    %c0_i32_0 = arith.constant 0 : i32
    %c0_i32_1 = arith.constant 0 : i32
    return %c0_i32, %c0_i32_0 : i32, i32
  }
  func.func @transform_12(%arg0: i32) -> (i32, i32) {
    %c0_i32 = arith.constant 0 : i32
    %c0_i32_0 = arith.constant 0 : i32
    %c0_i32_1 = arith.constant 0 : i32
    return %c0_i32, %c0_i32_0 : i32, i32
  }
  func.func @transform_13(%arg0: i32) -> (i32, i32) {
    %c0_i32 = arith.constant 0 : i32
    %c0_i32_0 = arith.constant 0 : i32
    %c0_i32_1 = arith.constant 0 : i32
    return %c0_i32, %c0_i32_0 : i32, i32
  }
  func.func @transform_14(%arg0: i32) -> (i32, i32) {
    %c0_i32 = arith.constant 0 : i32
    %c0_i32_0 = arith.constant 0 : i32
    %c0_i32_1 = arith.constant 0 : i32
    return %c0_i32, %c0_i32_0 : i32, i32
  }
  func.func @transform_15(%arg0: i32) -> (i32, i32) {
    %c0_i32 = arith.constant 0 : i32
    %c0_i32_0 = arith.constant 0 : i32
    %c0_i32_1 = arith.constant 0 : i32
    return %c0_i32, %c0_i32_0 : i32, i32
  }
  func.func @transform_16(%arg0: i32) -> (i32, i32) {
    %c0_i32 = arith.constant 0 : i32
    %c0_i32_0 = arith.constant 0 : i32
    %c0_i32_1 = arith.constant 0 : i32
    return %c0_i32, %c0_i32_0 : i32, i32
  }
  func.func @transform_17(%arg0: i32) -> (i32, i32) {
    %c0_i32 = arith.constant 0 : i32
    %c0_i32_0 = arith.constant 0 : i32
    %c0_i32_1 = arith.constant 0 : i32
    return %c0_i32, %c0_i32_0 : i32, i32
  }
  func.func @transform_18(%arg0: i32) -> (i32, i32) {
    %c0_i32 = arith.constant 0 : i32
    %c0_i32_0 = arith.constant 0 : i32
    %c0_i32_1 = arith.constant 0 : i32
    return %c0_i32, %c0_i32_0 : i32, i32
  }
  func.func @transform_19(%arg0: i32) -> (i32, i32) {
    %c0_i32 = arith.constant 0 : i32
    %c0_i32_0 = arith.constant 0 : i32
    %c0_i32_1 = arith.constant 0 : i32
    return %c0_i32, %c0_i32_0 : i32, i32
  }
  func.func @transform_20(%arg0: i32) -> (i32, i32) {
    %c0_i32 = arith.constant 0 : i32
    %c0_i32_0 = arith.constant 0 : i32
    return %arg0, %c0_i32 : i32, i32
  }
}

module attributes {stable_mosaic.version = 11 : i64} {
  func.func @film_kernel(%arg0: i32, %arg1: memref<16x128xbf16, #tpu.memory_space<vmem>>, %arg2: memref<16x128xbf16, #tpu.memory_space<vmem>>, %arg3: memref<128x128xbf16, #tpu.memory_space<vmem>>, %arg4: memref<1x128xf32, #tpu.memory_space<vmem>>, %arg5: memref<128x128xbf16, #tpu.memory_space<vmem>>, %arg6: memref<1x128xf32, #tpu.memory_space<vmem>>, %arg7: memref<128x128xbf16, #tpu.memory_space<vmem>>, %arg8: memref<1x128xf32, #tpu.memory_space<vmem>>, %arg9: memref<128x128xbf16, #tpu.memory_space<vmem>>, %arg10: memref<1x128xf32, #tpu.memory_space<vmem>>, %arg11: memref<128x128xbf16, #tpu.memory_space<vmem>>, %arg12: memref<1x128xf32, #tpu.memory_space<vmem>>, %arg13: memref<128x512xbf16, #tpu.memory_space<vmem>>, %arg14: memref<1x512xf32, #tpu.memory_space<vmem>>, %arg15: memref<128x128xbf16, #tpu.memory_space<vmem>>, %arg16: memref<1x128xf32, #tpu.memory_space<vmem>>, %arg17: memref<128x128xbf16, #tpu.memory_space<vmem>>, %arg18: memref<1x128xf32, #tpu.memory_space<vmem>>, %arg19: memref<128x128xbf16, #tpu.memory_space<vmem>>, %arg20: memref<1x128xf32, #tpu.memory_space<vmem>>, %arg21: memref<16x128xf32, #tpu.memory_space<vmem>>) attributes {dimension_semantics = [#tpu.dimension_semantics<parallel>], iteration_bounds = array<i64: 3>, scalar_prefetch = 0 : i64, scratch_operands = 0 : i64, tpu.core_type = #tpu.core_type<tc>, window_params = [{transform_indices = @transform_0, window_bounds = array<i64: 16, 128>}, {transform_indices = @transform_1, window_bounds = array<i64: 16, 128>}, {pipeline_mode = #tpu.pipeline_mode<synchronous>, transform_indices = @transform_2, window_bounds = array<i64: 128, 128>}, {pipeline_mode = #tpu.pipeline_mode<synchronous>, transform_indices = @transform_3, window_bounds = array<i64: 1, 128>}, {pipeline_mode = #tpu.pipeline_mode<synchronous>, transform_indices = @transform_4, window_bounds = array<i64: 128, 128>}, {pipeline_mode = #tpu.pipeline_mode<synchronous>, transform_indices = @transform_5, window_bounds = array<i64: 1, 128>}, {pipeline_mode = #tpu.pipeline_mode<synchronous>, transform_indices = @transform_6, window_bounds = array<i64: 128, 128>}, {pipeline_mode = #tpu.pipeline_mode<synchronous>, transform_indices = @transform_7, window_bounds = array<i64: 1, 128>}, {pipeline_mode = #tpu.pipeline_mode<synchronous>, transform_indices = @transform_8, window_bounds = array<i64: 128, 128>}, {pipeline_mode = #tpu.pipeline_mode<synchronous>, transform_indices = @transform_9, window_bounds = array<i64: 1, 128>}, {pipeline_mode = #tpu.pipeline_mode<synchronous>, transform_indices = @transform_10, window_bounds = array<i64: 128, 128>}, {pipeline_mode = #tpu.pipeline_mode<synchronous>, transform_indices = @transform_11, window_bounds = array<i64: 1, 128>}, {pipeline_mode = #tpu.pipeline_mode<synchronous>, transform_indices = @transform_12, window_bounds = array<i64: 128, 512>}, {pipeline_mode = #tpu.pipeline_mode<synchronous>, transform_indices = @transform_13, window_bounds = array<i64: 1, 512>}, {pipeline_mode = #tpu.pipeline_mode<synchronous>, transform_indices = @transform_14, window_bounds = array<i64: 128, 128>}, {pipeline_mode = #tpu.pipeline_mode<synchronous>, transform_indices = @transform_15, window_bounds = array<i64: 1, 128>}, {pipeline_mode = #tpu.pipeline_mode<synchronous>, transform_indices = @transform_16, window_bounds = array<i64: 128, 128>}, {pipeline_mode = #tpu.pipeline_mode<synchronous>, transform_indices = @transform_17, window_bounds = array<i64: 1, 128>}, {pipeline_mode = #tpu.pipeline_mode<synchronous>, transform_indices = @transform_18, window_bounds = array<i64: 128, 128>}, {pipeline_mode = #tpu.pipeline_mode<synchronous>, transform_indices = @transform_19, window_bounds = array<i64: 1, 128>}, {transform_indices = @transform_20, window_bounds = array<i64: 16, 128>}]} {
    %c0 = arith.constant 0 : index
    %c0_0 = arith.constant 0 : index
    %0 = vector.load %arg1[%c0, %c0_0] : memref<16x128xbf16, #tpu.memory_space<vmem>>, vector<16x128xbf16>
    %c0_1 = arith.constant 0 : index
    %c0_2 = arith.constant 0 : index
    %1 = vector.load %arg3[%c0_1, %c0_2] : memref<128x128xbf16, #tpu.memory_space<vmem>>, vector<128x128xbf16>
    %cst = arith.constant dense<0.000000e+00> : vector<16x128xf32>
    %2 = tpu.matmul %0, %1, %cst {dimension_numbers = #tpu.dot_dimension_numbers<[1], [0], [0], [1], [0, 0, 1, 1], [], []>} : vector<16x128xbf16>, vector<128x128xbf16>, vector<16x128xf32> -> vector<16x128xf32>
    %c0_3 = arith.constant 0 : index
    %c0_4 = arith.constant 0 : index
    %3 = vector.load %arg4[%c0_3, %c0_4] : memref<1x128xf32, #tpu.memory_space<vmem>>, vector<1x128xf32>
    %4 = vector.broadcast %3 : vector<1x128xf32> to vector<16x128xf32>
    %5 = arith.addf %2, %4 : vector<16x128xf32>
    %cst_5 = arith.constant 0.000000e+00 : f32
    %6 = vector.broadcast %cst_5 : f32 to vector<16x128xf32>
    %7 = arith.cmpf ogt, %5, %6 : vector<16x128xf32>
    %cst_6 = arith.constant 2.000000e-01 : f32
    %8 = vector.broadcast %cst_6 : f32 to vector<16x128xf32>
    %9 = arith.mulf %8, %5 : vector<16x128xf32>
    %10 = arith.select %7, %5, %9 : vector<16x128xi1>, vector<16x128xf32>
    %11 = arith.truncf %10 : vector<16x128xf32> to vector<16x128xbf16>
    %c0_7 = arith.constant 0 : index
    %c0_8 = arith.constant 0 : index
    %12 = vector.load %arg5[%c0_7, %c0_8] : memref<128x128xbf16, #tpu.memory_space<vmem>>, vector<128x128xbf16>
    %cst_9 = arith.constant dense<0.000000e+00> : vector<16x128xf32>
    %13 = tpu.matmul %11, %12, %cst_9 {dimension_numbers = #tpu.dot_dimension_numbers<[1], [0], [0], [1], [0, 0, 1, 1], [], []>} : vector<16x128xbf16>, vector<128x128xbf16>, vector<16x128xf32> -> vector<16x128xf32>
    %c0_10 = arith.constant 0 : index
    %c0_11 = arith.constant 0 : index
    %14 = vector.load %arg6[%c0_10, %c0_11] : memref<1x128xf32, #tpu.memory_space<vmem>>, vector<1x128xf32>
    %15 = vector.broadcast %14 : vector<1x128xf32> to vector<16x128xf32>
    %16 = arith.addf %13, %15 : vector<16x128xf32>
    %cst_12 = arith.constant 0.000000e+00 : f32
    %17 = vector.broadcast %cst_12 : f32 to vector<16x128xf32>
    %18 = arith.cmpf ogt, %16, %17 : vector<16x128xf32>
    %cst_13 = arith.constant 2.000000e-01 : f32
    %19 = vector.broadcast %cst_13 : f32 to vector<16x128xf32>
    %20 = arith.mulf %19, %16 : vector<16x128xf32>
    %21 = arith.select %18, %16, %20 : vector<16x128xi1>, vector<16x128xf32>
    %22 = arith.truncf %21 : vector<16x128xf32> to vector<16x128xbf16>
    %c0_14 = arith.constant 0 : index
    %c0_15 = arith.constant 0 : index
    %23 = vector.load %arg7[%c0_14, %c0_15] : memref<128x128xbf16, #tpu.memory_space<vmem>>, vector<128x128xbf16>
    %cst_16 = arith.constant dense<0.000000e+00> : vector<16x128xf32>
    %24 = tpu.matmul %22, %23, %cst_16 {dimension_numbers = #tpu.dot_dimension_numbers<[1], [0], [0], [1], [0, 0, 1, 1], [], []>} : vector<16x128xbf16>, vector<128x128xbf16>, vector<16x128xf32> -> vector<16x128xf32>
    %c0_17 = arith.constant 0 : index
    %c0_18 = arith.constant 0 : index
    %25 = vector.load %arg8[%c0_17, %c0_18] : memref<1x128xf32, #tpu.memory_space<vmem>>, vector<1x128xf32>
    %26 = vector.broadcast %25 : vector<1x128xf32> to vector<16x128xf32>
    %27 = arith.addf %24, %26 : vector<16x128xf32>
    %cst_19 = arith.constant 0.000000e+00 : f32
    %28 = vector.broadcast %cst_19 : f32 to vector<16x128xf32>
    %29 = arith.cmpf ogt, %27, %28 : vector<16x128xf32>
    %cst_20 = arith.constant 2.000000e-01 : f32
    %30 = vector.broadcast %cst_20 : f32 to vector<16x128xf32>
    %31 = arith.mulf %30, %27 : vector<16x128xf32>
    %32 = arith.select %29, %27, %31 : vector<16x128xi1>, vector<16x128xf32>
    %33 = arith.truncf %32 : vector<16x128xf32> to vector<16x128xbf16>
    %c0_21 = arith.constant 0 : index
    %c0_22 = arith.constant 0 : index
    %34 = vector.load %arg2[%c0_21, %c0_22] : memref<16x128xbf16, #tpu.memory_space<vmem>>, vector<16x128xbf16>
    %c0_23 = arith.constant 0 : index
    %c0_24 = arith.constant 0 : index
    %35 = vector.load %arg9[%c0_23, %c0_24] : memref<128x128xbf16, #tpu.memory_space<vmem>>, vector<128x128xbf16>
    %cst_25 = arith.constant dense<0.000000e+00> : vector<16x128xf32>
    %36 = tpu.matmul %34, %35, %cst_25 {dimension_numbers = #tpu.dot_dimension_numbers<[1], [0], [0], [1], [0, 0, 1, 1], [], []>} : vector<16x128xbf16>, vector<128x128xbf16>, vector<16x128xf32> -> vector<16x128xf32>
    %c0_26 = arith.constant 0 : index
    %c0_27 = arith.constant 0 : index
    %37 = vector.load %arg10[%c0_26, %c0_27] : memref<1x128xf32, #tpu.memory_space<vmem>>, vector<1x128xf32>
    %38 = vector.broadcast %37 : vector<1x128xf32> to vector<16x128xf32>
    %39 = arith.addf %36, %38 : vector<16x128xf32>
    %cst_28 = arith.constant 0.000000e+00 : f32
    %40 = vector.broadcast %cst_28 : f32 to vector<16x128xf32>
    %41 = arith.cmpf ogt, %39, %40 : vector<16x128xf32>
    %cst_29 = arith.constant 2.000000e-01 : f32
    %42 = vector.broadcast %cst_29 : f32 to vector<16x128xf32>
    %43 = arith.mulf %42, %39 : vector<16x128xf32>
    %44 = arith.select %41, %39, %43 : vector<16x128xi1>, vector<16x128xf32>
    %45 = arith.truncf %44 : vector<16x128xf32> to vector<16x128xbf16>
    %c0_30 = arith.constant 0 : index
    %c0_31 = arith.constant 0 : index
    %46 = vector.load %arg11[%c0_30, %c0_31] : memref<128x128xbf16, #tpu.memory_space<vmem>>, vector<128x128xbf16>
    %cst_32 = arith.constant dense<0.000000e+00> : vector<16x128xf32>
    %47 = tpu.matmul %45, %46, %cst_32 {dimension_numbers = #tpu.dot_dimension_numbers<[1], [0], [0], [1], [0, 0, 1, 1], [], []>} : vector<16x128xbf16>, vector<128x128xbf16>, vector<16x128xf32> -> vector<16x128xf32>
    %c0_33 = arith.constant 0 : index
    %c0_34 = arith.constant 0 : index
    %48 = vector.load %arg12[%c0_33, %c0_34] : memref<1x128xf32, #tpu.memory_space<vmem>>, vector<1x128xf32>
    %49 = vector.broadcast %48 : vector<1x128xf32> to vector<16x128xf32>
    %50 = arith.addf %47, %49 : vector<16x128xf32>
    %cst_35 = arith.constant 0.000000e+00 : f32
    %51 = vector.broadcast %cst_35 : f32 to vector<16x128xf32>
    %52 = arith.cmpf ogt, %50, %51 : vector<16x128xf32>
    %cst_36 = arith.constant 2.000000e-01 : f32
    %53 = vector.broadcast %cst_36 : f32 to vector<16x128xf32>
    %54 = arith.mulf %53, %50 : vector<16x128xf32>
    %55 = arith.select %52, %50, %54 : vector<16x128xi1>, vector<16x128xf32>
    %56 = arith.truncf %55 : vector<16x128xf32> to vector<16x128xbf16>
    %c0_37 = arith.constant 0 : index
    %c0_38 = arith.constant 0 : index
    %57 = vector.load %arg13[%c0_37, %c0_38] : memref<128x512xbf16, #tpu.memory_space<vmem>>, vector<128x512xbf16>
    %cst_39 = arith.constant dense<0.000000e+00> : vector<16x512xf32>
    %58 = tpu.matmul %56, %57, %cst_39 {dimension_numbers = #tpu.dot_dimension_numbers<[1], [0], [0], [1], [0, 0, 1, 1], [], []>} : vector<16x128xbf16>, vector<128x512xbf16>, vector<16x512xf32> -> vector<16x512xf32>
    %c0_40 = arith.constant 0 : index
    %c0_41 = arith.constant 0 : index
    %59 = vector.load %arg14[%c0_40, %c0_41] : memref<1x512xf32, #tpu.memory_space<vmem>>, vector<1x512xf32>
    %60 = vector.broadcast %59 : vector<1x512xf32> to vector<16x512xf32>
    %61 = arith.addf %58, %60 : vector<16x512xf32>
    %62 = vector.extract_strided_slice %61 {offsets = [0, 0], sizes = [16, 128], strides = [1, 1]} : vector<16x512xf32> to vector<16x128xf32>
    %63 = vector.extract_strided_slice %61 {offsets = [0, 128], sizes = [16, 128], strides = [1, 1]} : vector<16x512xf32> to vector<16x128xf32>
    %64 = vector.extract_strided_slice %61 {offsets = [0, 256], sizes = [16, 128], strides = [1, 1]} : vector<16x512xf32> to vector<16x128xf32>
    %65 = vector.extract_strided_slice %61 {offsets = [0, 384], sizes = [16, 128], strides = [1, 1]} : vector<16x512xf32> to vector<16x128xf32>
    %66 = arith.extf %33 : vector<16x128xbf16> to vector<16x128xf32>
    %67 = arith.mulf %62, %66 : vector<16x128xf32>
    %68 = arith.addf %67, %63 : vector<16x128xf32>
    %69 = arith.truncf %68 : vector<16x128xf32> to vector<16x128xbf16>
    %c0_42 = arith.constant 0 : index
    %c0_43 = arith.constant 0 : index
    %70 = vector.load %arg15[%c0_42, %c0_43] : memref<128x128xbf16, #tpu.memory_space<vmem>>, vector<128x128xbf16>
    %cst_44 = arith.constant dense<0.000000e+00> : vector<16x128xf32>
    %71 = tpu.matmul %69, %70, %cst_44 {dimension_numbers = #tpu.dot_dimension_numbers<[1], [0], [0], [1], [0, 0, 1, 1], [], []>} : vector<16x128xbf16>, vector<128x128xbf16>, vector<16x128xf32> -> vector<16x128xf32>
    %c0_45 = arith.constant 0 : index
    %c0_46 = arith.constant 0 : index
    %72 = vector.load %arg16[%c0_45, %c0_46] : memref<1x128xf32, #tpu.memory_space<vmem>>, vector<1x128xf32>
    %73 = vector.broadcast %72 : vector<1x128xf32> to vector<16x128xf32>
    %74 = arith.addf %71, %73 : vector<16x128xf32>
    %cst_47 = arith.constant 0.000000e+00 : f32
    %75 = vector.broadcast %cst_47 : f32 to vector<16x128xf32>
    %76 = arith.cmpf ogt, %74, %75 : vector<16x128xf32>
    %cst_48 = arith.constant 2.000000e-01 : f32
    %77 = vector.broadcast %cst_48 : f32 to vector<16x128xf32>
    %78 = arith.mulf %77, %74 : vector<16x128xf32>
    %79 = arith.select %76, %74, %78 : vector<16x128xi1>, vector<16x128xf32>
    %80 = arith.truncf %79 : vector<16x128xf32> to vector<16x128xbf16>
    %81 = arith.extf %80 : vector<16x128xbf16> to vector<16x128xf32>
    %82 = arith.mulf %64, %81 : vector<16x128xf32>
    %83 = arith.addf %82, %65 : vector<16x128xf32>
    %84 = arith.truncf %83 : vector<16x128xf32> to vector<16x128xbf16>
    %c0_49 = arith.constant 0 : index
    %c0_50 = arith.constant 0 : index
    %85 = vector.load %arg17[%c0_49, %c0_50] : memref<128x128xbf16, #tpu.memory_space<vmem>>, vector<128x128xbf16>
    %cst_51 = arith.constant dense<0.000000e+00> : vector<16x128xf32>
    %86 = tpu.matmul %84, %85, %cst_51 {dimension_numbers = #tpu.dot_dimension_numbers<[1], [0], [0], [1], [0, 0, 1, 1], [], []>} : vector<16x128xbf16>, vector<128x128xbf16>, vector<16x128xf32> -> vector<16x128xf32>
    %c0_52 = arith.constant 0 : index
    %c0_53 = arith.constant 0 : index
    %87 = vector.load %arg18[%c0_52, %c0_53] : memref<1x128xf32, #tpu.memory_space<vmem>>, vector<1x128xf32>
    %88 = vector.broadcast %87 : vector<1x128xf32> to vector<16x128xf32>
    %89 = arith.addf %86, %88 : vector<16x128xf32>
    %cst_54 = arith.constant 0.000000e+00 : f32
    %90 = vector.broadcast %cst_54 : f32 to vector<16x128xf32>
    %91 = arith.cmpf ogt, %89, %90 : vector<16x128xf32>
    %cst_55 = arith.constant 2.000000e-01 : f32
    %92 = vector.broadcast %cst_55 : f32 to vector<16x128xf32>
    %93 = arith.mulf %92, %89 : vector<16x128xf32>
    %94 = arith.select %91, %89, %93 : vector<16x128xi1>, vector<16x128xf32>
    %95 = arith.truncf %94 : vector<16x128xf32> to vector<16x128xbf16>
    %c0_56 = arith.constant 0 : index
    %c0_57 = arith.constant 0 : index
    %96 = vector.load %arg19[%c0_56, %c0_57] : memref<128x128xbf16, #tpu.memory_space<vmem>>, vector<128x128xbf16>
    %cst_58 = arith.constant dense<0.000000e+00> : vector<16x128xf32>
    %97 = tpu.matmul %95, %96, %cst_58 {dimension_numbers = #tpu.dot_dimension_numbers<[1], [0], [0], [1], [0, 0, 1, 1], [], []>} : vector<16x128xbf16>, vector<128x128xbf16>, vector<16x128xf32> -> vector<16x128xf32>
    %c0_59 = arith.constant 0 : index
    %c0_60 = arith.constant 0 : index
    %98 = vector.load %arg20[%c0_59, %c0_60] : memref<1x128xf32, #tpu.memory_space<vmem>>, vector<1x128xf32>
    %99 = vector.broadcast %98 : vector<1x128xf32> to vector<16x128xf32>
    %100 = arith.addf %97, %99 : vector<16x128xf32>
    %c0_61 = arith.constant 0 : index
    %c0_62 = arith.constant 0 : index
    %101 = vector.load %arg21[%c0_61, %c0_62] : memref<16x128xf32, #tpu.memory_space<vmem>>, vector<16x128xf32>
    tpu.vector_store %arg21[%c0_61, %c0_62], %100 {strides = array<i32>} : memref<16x128xf32, #tpu.memory_space<vmem>>, vector<16x128xf32>,
    return
  }
  func.func @transform_0(%arg0: i32) -> (i32, i32) {
    %c0_i32 = arith.constant 0 : i32
    %c0_i32_0 = arith.constant 0 : i32
    return %arg0, %c0_i32 : i32, i32
  }
  func.func @transform_1(%arg0: i32) -> (i32, i32) {
    %c0_i32 = arith.constant 0 : i32
    %c0_i32_0 = arith.constant 0 : i32
    return %arg0, %c0_i32 : i32, i32
  }
  func.func @transform_2(%arg0: i32) -> (i32, i32) {
    %c0_i32 = arith.constant 0 : i32
    %c0_i32_0 = arith.constant 0 : i32
    %c0_i32_1 = arith.constant 0 : i32
    return %c0_i32, %c0_i32_0 : i32, i32
  }
  func.func @transform_3(%arg0: i32) -> (i32, i32) {
    %c0_i32 = arith.constant 0 : i32
    %c0_i32_0 = arith.constant 0 : i32
    %c0_i32_1 = arith.constant 0 : i32
    return %c0_i32, %c0_i32_0 : i32, i32
  }
  func.func @transform_4(%arg0: i32) -> (i32, i32) {
    %c0_i32 = arith.constant 0 : i32
    %c0_i32_0 = arith.constant 0 : i32
    %c0_i32_1 = arith.constant 0 : i32
    return %c0_i32, %c0_i32_0 : i32, i32
  }
  func.func @transform_5(%arg0: i32) -> (i32, i32) {
    %c0_i32 = arith.constant 0 : i32
    %c0_i32_0 = arith.constant 0 : i32
    %c0_i32_1 = arith.constant 0 : i32
    return %c0_i32, %c0_i32_0 : i32, i32
  }
  func.func @transform_6(%arg0: i32) -> (i32, i32) {
    %c0_i32 = arith.constant 0 : i32
    %c0_i32_0 = arith.constant 0 : i32
    %c0_i32_1 = arith.constant 0 : i32
    return %c0_i32, %c0_i32_0 : i32, i32
  }
  func.func @transform_7(%arg0: i32) -> (i32, i32) {
    %c0_i32 = arith.constant 0 : i32
    %c0_i32_0 = arith.constant 0 : i32
    %c0_i32_1 = arith.constant 0 : i32
    return %c0_i32, %c0_i32_0 : i32, i32
  }
  func.func @transform_8(%arg0: i32) -> (i32, i32) {
    %c0_i32 = arith.constant 0 : i32
    %c0_i32_0 = arith.constant 0 : i32
    %c0_i32_1 = arith.constant 0 : i32
    return %c0_i32, %c0_i32_0 : i32, i32
  }
  func.func @transform_9(%arg0: i32) -> (i32, i32) {
    %c0_i32 = arith.constant 0 : i32
    %c0_i32_0 = arith.constant 0 : i32
    %c0_i32_1 = arith.constant 0 : i32
    return %c0_i32, %c0_i32_0 : i32, i32
  }
  func.func @transform_10(%arg0: i32) -> (i32, i32) {
    %c0_i32 = arith.constant 0 : i32
    %c0_i32_0 = arith.constant 0 : i32
    %c0_i32_1 = arith.constant 0 : i32
    return %c0_i32, %c0_i32_0 : i32, i32
  }
  func.func @transform_11(%arg0: i32) -> (i32, i32) {
    %c0_i32 = arith.constant 0 : i32
    %c0_i32_0 = arith.constant 0 : i32
    %c0_i32_1 = arith.constant 0 : i32
    return %c0_i32, %c0_i32_0 : i32, i32
  }
  func.func @transform_12(%arg0: i32) -> (i32, i32) {
    %c0_i32 = arith.constant 0 : i32
    %c0_i32_0 = arith.constant 0 : i32
    %c0_i32_1 = arith.constant 0 : i32
    return %c0_i32, %c0_i32_0 : i32, i32
  }
  func.func @transform_13(%arg0: i32) -> (i32, i32) {
    %c0_i32 = arith.constant 0 : i32
    %c0_i32_0 = arith.constant 0 : i32
    %c0_i32_1 = arith.constant 0 : i32
    return %c0_i32, %c0_i32_0 : i32, i32
  }
  func.func @transform_14(%arg0: i32) -> (i32, i32) {
    %c0_i32 = arith.constant 0 : i32
    %c0_i32_0 = arith.constant 0 : i32
    %c0_i32_1 = arith.constant 0 : i32
    return %c0_i32, %c0_i32_0 : i32, i32
  }
  func.func @transform_15(%arg0: i32) -> (i32, i32) {
    %c0_i32 = arith.constant 0 : i32
    %c0_i32_0 = arith.constant 0 : i32
    %c0_i32_1 = arith.constant 0 : i32
    return %c0_i32, %c0_i32_0 : i32, i32
  }
  func.func @transform_16(%arg0: i32) -> (i32, i32) {
    %c0_i32 = arith.constant 0 : i32
    %c0_i32_0 = arith.constant 0 : i32
    %c0_i32_1 = arith.constant 0 : i32
    return %c0_i32, %c0_i32_0 : i32, i32
  }
  func.func @transform_17(%arg0: i32) -> (i32, i32) {
    %c0_i32 = arith.constant 0 : i32
    %c0_i32_0 = arith.constant 0 : i32
    %c0_i32_1 = arith.constant 0 : i32
    return %c0_i32, %c0_i32_0 : i32, i32
  }
  func.func @transform_18(%arg0: i32) -> (i32, i32) {
    %c0_i32 = arith.constant 0 : i32
    %c0_i32_0 = arith.constant 0 : i32
    %c0_i32_1 = arith.constant 0 : i32
    return %c0_i32, %c0_i32_0 : i32, i32
  }
  func.func @transform_19(%arg0: i32) -> (i32, i32) {
    %c0_i32 = arith.constant 0 : i32
    %c0_i32_0 = arith.constant 0 : i32
    %c0_i32_1 = arith.constant 0 : i32
    return %c0_i32, %c0_i32_0 : i32, i32
  }
  func.func @transform_20(%arg0: i32) -> (i32, i32) {
    %c0_i32 = arith.constant 0 : i32
    %c0_i32_0 = arith.constant 0 : i32
    return %arg0, %c0_i32 : i32, i32
  }
}

</mosaic_0001>

<bundles_post_ra>
// kernel: film_forward.1
= control target key start
LH: loop header
LB: loop body
LE: loop exit
PB: predicated region body
PF: predicated region fallthrough
CT: control target
= control target key end

     0   :  { %s3591_s0 = inlined_call_operand.vmem [shape: bf16[48,128], index: 0, kind: input, shape index: {}]   ;;  %s3592_s1 = inlined_call_operand.vmem [shape: bf16[48,128], index: 1, kind: input, shape index: {}]   ;;  %s3593_s2 = inlined_call_operand.vmem [shape: bf16[128,128], index: 2, kind: input, shape index: {}]   ;;  %s3594_s3 = inlined_call_operand.hbm [shape: f32[1,128], index: 3, kind: input, shape index: {}]   ;;  %s3595_s4 = inlined_call_operand.vmem [shape: bf16[128,128], index: 4, kind: input, shape index: {}]   ;;  %s3596_s5 = inlined_call_operand.hbm [shape: f32[1,128], index: 5, kind: input, shape index: {}]   ;;  %s3597_s6 = inlined_call_operand.hbm [shape: bf16[128,128], index: 6, kind: input, shape index: {}]   ;;  %s3598_s7 = inlined_call_operand.hbm [shape: f32[1,128], index: 7, kind: input, shape index: {}]   ;;  %s3599_s8 = inlined_call_operand.hbm [shape: bf16[128,128], index: 8, kind: input, shape index: {}]   ;;  %s3600_s9 = inlined_call_operand.hbm [shape: f32[1,128], index: 9, kind: input, shape index: {}]   ;;  %s3601_s10 = inlined_call_operand.hbm [shape: bf16[128,128], index: 10, kind: input, shape index: {}]   ;;  %s3602_s11 = inlined_call_operand.hbm [shape: f32[1,128], index: 11, kind: input, shape index: {}]   ;;  %s3603_s12 = inlined_call_operand.hbm [shape: bf16[128,512], index: 12, kind: input, shape index: {}]   ;;  %s3604_s13 = inlined_call_operand.hbm [shape: f32[1,512], index: 13, kind: input, shape index: {}]   ;;  %s3605_s14 = inlined_call_operand.hbm [shape: bf16[128,128], index: 14, kind: input, shape index: {}]   ;;  %s3606_s15 = inlined_call_operand.hbm [shape: f32[1,128], index: 15, kind: input, shape index: {}]   ;;  %s3607_s16 = inlined_call_operand.vmem [shape: bf16[128,128], index: 16, kind: input, shape index: {}]   ;;  %s3608_s17 = inlined_call_operand.hbm [shape: f32[1,128], index: 17, kind: input, shape index: {}]   ;;  %s3609_s18 = inlined_call_operand.hbm [shape: bf16[128,128], index: 18, kind: input, shape index: {}]   ;;  %s3610_s19 = inlined_call_operand.vmem [shape: f32[1,128], index: 19, kind: input, shape index: {}]   ;;  %s3611_s20 = inlined_call_operand.vmem [shape: f32[48,128], index: 20, kind: output, shape index: {}]  }
   0x1   :  { %3615 = sst [smem:[#allocation32_spill]] %s3591_s0 }
   0x2   :  { %3616 = sst [smem:[#allocation33_spill]] %s3592_s1 }
   0x3   :  { %3617 = sst [smem:[#allocation34_spill]] %s3593_s2 }
   0x4   :  { %3618 = sst [smem:[#allocation35_spill]] %s3594_s3 }
   0x5   :  { %3619 = sst [smem:[#allocation36_spill]] %s3595_s4 }
   0x6   :  { %3620 = sst [smem:[#allocation37_spill]] %s3596_s5 }
   0x7   :  { %3621 = sst [smem:[#allocation38_spill]] %s3597_s6 }
   0x8   :  { %3622 = sst [smem:[#allocation39_spill]] %s3598_s7 }
   0x9   :  { %3623 = sst [smem:[#allocation40_spill]] %s3599_s8 }
   0xa   :  { %3624 = sst [smem:[#allocation41_spill]] %s3600_s9 }
   0xb   :  { %25 = vsyncpa [#allocation3], 0 }
   0xc   :  { %26 = vsyncpa [#allocation5], 0 }
   0xd   :  { %27 = vsyncpa [#allocation8], 0 }
   0xe   :  { %28 = vsyncpa [#allocation11], 0 }
   0xf   :  { %29 = vsyncpa [#allocation14], 0 }
  0x10   :  { %30 = vsyncpa [#allocation17], 0 }
  0x11   :  { %31 = vsyncpa [#allocation20], 0 }
  0x12   :  { %32 = vsyncpa [#allocation23], 0  ;;  %s3347_s1 = smov 0  }
  0x13 LB: > { %s3625_s5 = sld [smem:[#allocation37_spill]]  ;;  %s3614_s2 = sadd.s32 4294967295, %s3222_s1   ;;  %s3222_s1 = sphi %s3347_s1, %s38_s1  }
  0x14   : > { %p2074_p0 = scmp.ge.s32.totalorder %s3222_s1, 1  ;;  %p499_p1 = scmp.lt.s32.totalorder %s3222_s1, 4 }
  0x15   : > { %p3360_p2 = scmp.eq.s32.totalorder %s3614_s2, 0  ;;  %s3224_s26 = smov [#allocation4]  }
  0x16   : > { %p3364_p3 = pnand %p2074_p0, %p499_p1  ;;  %s531_s27 = sshll.u32 %s3224_s26, 4  ;;  %s532_s27 = int_to_ptr.vmem [resolvable:$true] %s531_s27 }
  0x17   : > { %s3628_s7 = sld [smem:[#allocation39_spill]]  ;;  %s3225_s23 = smov [#allocation7]  }
  0x18   : > { %p2659_p4 = pneg %p3364_p3  ;;  %s3629_s9 = sld [smem:[#allocation41_spill]] }
  0x19   : > { %s529_s24 = sshll.u32 %s3625_s5, 4  ;;  %s557_s26 = sshll.u32 %s3225_s23, 4  ;;  %s530_s24 = int_to_ptr.hbm [resolvable:$true] %s529_s24  ;;  %s558_s26 = int_to_ptr.vmem [resolvable:$true] %s557_s26 }
  0x1a   : > { %p3378_p5 = pnand %p3360_p2, %p2659_p4  ;;  %s3226_s28 = smov [#allocation10]  }
  0x1b   : > { %s583_s4 = sshll.u32 %s3226_s28, 4  ;;  %s607_s2 = sshll.u32 %s3602_s11, 4  ;;  %s584_s4 = int_to_ptr.vmem [resolvable:$true] %s583_s4  ;;  %s608_s2 = int_to_ptr.hbm [resolvable:$true] %s607_s2 }
  0x1c   : > { %2665 = dma.hbm_to_vmem [thread:$0]  (!%p3378_p5), %s530_s24, 16, %s532_s27, [#allocation5]  }
  0x1d   : > { %s555_s29 = sshll.u32 %s3628_s7, 4  ;;  %s633_s7 = sshll.u32 %s3604_s13, 4  ;;  %s556_s29 = int_to_ptr.hbm [resolvable:$true] %s555_s29  ;;  %s634_s7 = int_to_ptr.hbm [resolvable:$true] %s633_s7 }
  0x1e   : > { %s581_s21 = sshll.u32 %s3629_s9, 4  ;;  %s3227_s9 = smov [#allocation13]   ;;  %s582_s21 = int_to_ptr.hbm [resolvable:$true] %s581_s21 }
  0x1f   : > { %2671 = dma.hbm_to_vmem [thread:$0]  (!%p3378_p5), %s556_s29, 16, %s558_s26, [#allocation8]  }
  0x20   : > { %2677 = dma.hbm_to_vmem [thread:$0]  (!%p3378_p5), %s582_s21, 16, %s584_s4, [#allocation11]  }
  0x21   : > { %s609_s24 = sshll.u32 %s3227_s9, 4  ;;  %s3228_s27 = smov [#allocation16]   ;;  %s610_s24 = int_to_ptr.vmem [resolvable:$true] %s609_s24 }
  0x22   : > { %2683 = dma.hbm_to_vmem [thread:$0]  (!%p3378_p5), %s608_s2, 16, %s610_s24, [#allocation14]  }
  0x23   : > { %s635_s29 = sshll.u32 %s3228_s27, 4  ;;  %s659_s30 = sshll.u32 %s3606_s15, 4  ;;  %s636_s29 = int_to_ptr.vmem [resolvable:$true] %s635_s29  ;;  %s660_s30 = int_to_ptr.hbm [resolvable:$true] %s659_s30 }
  0x24   : > { %2689 = dma.hbm_to_vmem [thread:$0]  (!%p3378_p5), %s634_s7, 64, %s636_s29, [#allocation17]  }
  0x25   : > { %s3631_s4 = sld [smem:[#allocation35_spill]]  ;;  %s3229_s9 = smov [#allocation19]  }
  0x26   : > { %s661_s23 = sshll.u32 %s3229_s9, 4  ;;  %s3230_s2 = smov [#allocation2]   ;;  %s662_s23 = int_to_ptr.vmem [resolvable:$true] %s661_s23 }
  0x27   : > { %2695 = dma.hbm_to_vmem [thread:$0]  (!%p3378_p5), %s660_s30, 16, %s662_s23, [#allocation20]  }
  0x28   : > { %s516_s24 = sshll.u32 %s3230_s2, 4  ;;  %s3632_s6 = sld [smem:[#allocation38_spill]]  ;;  %s517_s24 = int_to_ptr.vmem [resolvable:$true] %s516_s24 }
  0x29   : > { %s3231_s7 = smov [#allocation6]   ;;  %s3633_s8 = sld [smem:[#allocation40_spill]] }
  0x2a   : > { %s542_s29 = sshll.u32 %s3231_s7, 4  ;;  %s3232_s30 = smov 64   ;;  %s543_s29 = int_to_ptr.vmem [resolvable:$true] %s542_s29 }
  0x2b   : > { %s514_s0 = sshll.u32 %s3631_s4, 4  ;;  %s3233_s9 = smov 4   ;;  %s515_s0 = int_to_ptr.hbm [resolvable:$true] %s514_s0 }
  0x2c   : > { %2662 = dma.hbm_to_vmem [thread:$0]  (!%p3378_p5), %s515_s0, 16, %s517_s24, [#allocation3]  }
  0x2d   : > { %s3234_s23 = smov [#allocation9]   ;;  %s592_s24 = sshll.u32 %s3601_s10, 4  ;;  %s593_s24 = int_to_ptr.hbm [resolvable:$true] %s592_s24 }
  0x2e   : > { %s540_s28 = sshll.u32 %s3632_s6, 4  ;;  %s568_s2 = sshll.u32 %s3234_s23, 4  ;;  %s541_s28 = int_to_ptr.hbm [resolvable:$true] %s540_s28  ;;  %s569_s2 = int_to_ptr.vmem [resolvable:$true] %s568_s2 }
  0x2f   : > { %s566_s4 = sshll.u32 %s3633_s8, 4  ;;  %s618_s5 = sshll.u32 %s3603_s12, 4  ;;  %s567_s4 = int_to_ptr.hbm [resolvable:$true] %s566_s4  ;;  %s619_s5 = int_to_ptr.hbm [resolvable:$true] %s618_s5 }
  0x30   : > { %2668 = dma.hbm_to_vmem [thread:$0]  (!%p3378_p5), %s541_s28, 1024, %s543_s29, [#allocation5], %s3232_s30, %s3232_s30, %s3233_s9  }
  0x31   : > { %2674 = dma.hbm_to_vmem [thread:$0]  (!%p3378_p5), %s567_s4, 1024, %s569_s2, [#allocation8], %s3232_s30, %s3232_s30, %s3233_s9  }
  0x32   : > { %s3235_s28 = smov [#allocation12]   ;;  %s3236_s21 = smov [#allocation15]  }
  0x33   : > { %s594_s29 = sshll.u32 %s3235_s28, 4  ;;  %s620_s23 = sshll.u32 %s3236_s21, 4  ;;  %s595_s29 = int_to_ptr.vmem [resolvable:$true] %s594_s29  ;;  %s621_s23 = int_to_ptr.vmem [resolvable:$true] %s620_s23 }
  0x34   : > { %2680 = dma.hbm_to_vmem [thread:$0]  (!%p3378_p5), %s593_s24, 1024, %s595_s29, [#allocation11], %s3232_s30, %s3232_s30, %s3233_s9  }
  0x35   : > { %s3237_s27 = smov 256   ;;  %s3238_s4 = smov 16  }
  0x36   : > { %2686 = dma.hbm_to_vmem [thread:$0]  (!%p3378_p5), %s619_s5, 4096, %s621_s23, [#allocation14], %s3237_s27, %s3237_s27, %s3238_s4  }
  0x37   : > { %s644_s26 = sshll.u32 %s3605_s14, 4  ;;  %s3239_s7 = smov [#allocation18]   ;;  %s645_s26 = int_to_ptr.hbm [resolvable:$true] %s644_s26 }
  0x38   : > { %s646_s28 = sshll.u32 %s3239_s7, 4  ;;  %s674_s24 = sshll.u32 %s3608_s17, 4  ;;  %s647_s28 = int_to_ptr.vmem [resolvable:$true] %s646_s28  ;;  %s675_s24 = int_to_ptr.hbm [resolvable:$true] %s674_s24 }
  0x39   : > { %2692 = dma.hbm_to_vmem [thread:$0]  (!%p3378_p5), %s645_s26, 1024, %s647_s28, [#allocation17], %s3232_s30, %s3232_s30, %s3233_s9  }
  0x3a   : > { %s3240_s5 = smov [#allocation21]   ;;  %s685_s27 = sshll.u32 %s3609_s18, 4  ;;  %s686_s27 = int_to_ptr.hbm [resolvable:$true] %s685_s27 }
  0x3b   : > { %s676_s29 = sshll.u32 %s3240_s5, 4  ;;  %s3241_s4 = smov [#allocation22]   ;;  %s677_s29 = int_to_ptr.vmem [resolvable:$true] %s676_s29 }
  0x3c   : > { %2698 = dma.hbm_to_vmem [thread:$0]  (!%p3378_p5), %s675_s24, 16, %s677_s29, [#allocation20]  }
  0x3d   : > { %s687_s2 = sshll.u32 %s3241_s4, 4  ;;  %724 = sbr.rel (%p3364_p3) target bundleno = 1002 (0x3ea), region = 100  ;;  %s688_s2 = int_to_ptr.vmem [resolvable:$true] %s687_s2 }
  0x3e   : > { %2701 = dma.hbm_to_vmem [thread:$0]  (!%p3378_p5), %s686_s27, 1024, %s688_s2, [#allocation23], %s3232_s30, %s3232_s30, %s3233_s9  }
  0x42   : > { %3189 = dma.done.wait (%p3360_p2), [#allocation3], 16  }
  0x43   : > { %3191 = vsyncadd (%p3360_p2), [#allocation3], 4294967280 }
  0x44   : > { %3193 = dma.done.wait (%p3360_p2), [#allocation5], 1040  }
  0x45   : > { %3195 = vsyncadd (%p3360_p2), [#allocation5], 4294966256 }
  0x46   : > { %3197 = dma.done.wait (%p3360_p2), [#allocation8], 1040  }
  0x47   : > { %3199 = vsyncadd (%p3360_p2), [#allocation8], 4294966256 }
  0x48   : > { %3201 = dma.done.wait (%p3360_p2), [#allocation11], 1040  }
  0x49   : > { %3203 = vsyncadd (%p3360_p2), [#allocation11], 4294966256 }
  0x4a   : > { %3205 = dma.done.wait (%p3360_p2), [#allocation14], 4112  }
  0x4b   : > { %3207 = vsyncadd (%p3360_p2), [#allocation14], 4294963184 }
  0x4c   : > { %3209 = dma.done.wait (%p3360_p2), [#allocation17], 1088  }
  0x4d   : > { %3211 = vsyncadd (%p3360_p2), [#allocation17], 4294966208 }
  0x4e   : > { %3213 = dma.done.wait (%p3360_p2), [#allocation20], 32  }
  0x4f   : > { %3215 = vsyncadd (%p3360_p2), [#allocation20], 4294967264 }
  0x50   : > { %3217 = dma.done.wait (%p3360_p2), [#allocation23], 1024  }
  0x51   : > { %3219 = vsyncadd (%p3360_p2), [#allocation23], 4294966272  ;;  %s3634_s3 = sld [smem:[#allocation34_spill]]  ;;  %v2538_v1 = vld [vmem:[#allocation9 + $0x38] sm:$0xff]  ;;  %v2537_v3 = vld [vmem:[#allocation9 + $0x30] sm:$0xff]  ;;  %s3636_s21 = sadd.s32 4294967295, %s3222_s1  }
  0x52   : > { %1223 = vmatpush.bf16.msra.mxu3 %v2538_v1  ;;  %v2536_v5 = vld [vmem:[#allocation9 + $0x28] sm:$0xff]  ;;  %s3635_s7 = sld [smem:[#allocation36_spill]]  ;;  %v2535_v8 = vld [vmem:[#allocation9 + $0x20] sm:$0xff]  ;;  %s2105_s23 = sshll.u32 %s3636_s21, 1  ;;  %v2534_v12 = vld [vmem:[#allocation9 + $0x18] sm:$0xff] }
  0x53   : > { %p854_p6 = scmp.lt.s32.totalorder %s2105_s23, 5  ;;  %v2533_v15 = vld [vmem:[#allocation9 + $0x10] sm:$0xff]  ;;  %v2532_v17 = vld [vmem:[#allocation9 + $0x8] sm:$0xff]  ;;  %v2531_v19 = vld [vmem:[#allocation9] sm:$0xff]  ;;  %s3637_s21 = sld [smem:[#allocation32_spill]] }
  0x54   : > { %s3638_s6 = sld [smem:[#allocation33_spill]]  ;;  %v2546_v20 = vld [vmem:[#allocation12 + $0x38] sm:$0xff]  ;;  %v2545_v23 = vld [vmem:[#allocation12 + $0x30] sm:$0xff]  ;;  %v2544_v24 = vld [vmem:[#allocation12 + $0x28] sm:$0xff] }
  0x55   : > { %s3640_s23 = smov (!%p854_p6, %s2105_s23), 5  ;;  %v2543_v26 = vld [vmem:[#allocation12 + $0x20] sm:$0xff]  ;;  %v2542_v28 = vld [vmem:[#allocation12 + $0x18] sm:$0xff]  ;;  %v2541_v30 = vld [vmem:[#allocation12 + $0x10] sm:$0xff] }
  0x56   : > { %1224 = vmatpush.bf16.msra.mxu3 %v2537_v3  ;;  %s2106_s26 = sshll.u32 %s3640_s23, 2  ;;  %v2540_v32 = vld [vmem:[#allocation12 + $0x8] sm:$0xff]  ;;  %v2539_v33 = vld [vmem:[#allocation12] sm:$0xff]  ;;  %v2529_v34 = vld [vmem:[#allocation6 + $0x38] sm:$0xff]  ;;  %s2110_s5 = sshll.u32 %s3640_s23, 3 }
  0x57   : > { %v2513_v0 = vld [vmem:[%s3634_s3 + $0x38] sm:$0xff]  ;;  %v2512_v2 = vld [vmem:[%s3634_s3 + $0x30] sm:$0xff]  ;;  %v2511_v4 = vld [vmem:[%s3634_s3 + $0x28] sm:$0xff]  ;;  %1125 = vmatpush.bf16.msra.mxu2 %v2529_v34  ;;  %s869_s2 = scalar_lea.vmem %s3611_s20, %s2110_s5 }
  0x58   : > { %947 = vmatpush.bf16.msra.mxu0 %v2513_v0  ;;  %v2521_v6 = vld [vmem:[%s3635_s7 + $0x38] sm:$0xff]  ;;  %v2510_v7 = vld [vmem:[%s3634_s3 + $0x20] sm:$0xff]  ;;  %v2520_v9 = vld [vmem:[%s3635_s7 + $0x30] sm:$0xff] }
  0x59   : > { %1036 = vmatpush.bf16.msra.mxu1 %v2521_v6  ;;  %v2519_v10 = vld [vmem:[%s3635_s7 + $0x28] sm:$0xff]  ;;  %v2509_v11 = vld [vmem:[%s3634_s3 + $0x18] sm:$0xff]  ;;  %v2518_v13 = vld [vmem:[%s3635_s7 + $0x20] sm:$0xff]  ;;  %s857_s27 = scalar_lea.vmem %s3637_s21, %s2106_s26 }
  0x5a   : > { %1225 = vmatpush.bf16.msra.mxu3 %v2536_v5  ;;  %v2508_v14 = vld [vmem:[%s3634_s3 + $0x10] sm:$0xff]  ;;  %v2507_v16 = vld [vmem:[%s3634_s3 + $0x8] sm:$0xff]  ;;  %v2506_v18 = vld [vmem:[%s3634_s3] sm:$0xff]  ;;  %s863_s8 = scalar_lea.vmem %s3638_s6, %s2106_s26 }
  0x5b   : > { %v2505_v21 = vld [vmem:[%s857_s27] sm:$0xff]  ;;  %v2517_v25 = vld [vmem:[%s3635_s7 + $0x18] sm:$0xff]  ;;  %v2516_v27 = vld [vmem:[%s3635_s7 + $0x10] sm:$0xff] }
  0x5c   : > { %948 = vmatpush.bf16.msra.mxu0 %v2512_v2  ;;  %v2530_v22 = vld [vmem:[%s863_s8] sm:$0xff]  ;;  %v2515_v29 = vld [vmem:[%s3635_s7 + $0x8] sm:$0xff]  ;;  %v2528_v35 = vld [vmem:[#allocation6 + $0x30] sm:$0xff] }
  0x5d   : > { %1037 = vmatpush.bf16.msra.mxu1 %v2520_v9  ;;  %v2514_v31 = vld [vmem:[%s3635_s7] sm:$0xff]  ;;  %v2393_v36 = vld [vmem:[#allocation15 + $0xe0] sm:$0xf]  ;;  %v2577_v37 = vld [vmem:[#allocation15 + $0xec] sm:$0xf0]  ;;  %1126 = vmatpush.bf16.msra.mxu2 %v2528_v35 }
  0x5e   : > { %1226 = vmatpush.bf16.msra.mxu3 %v2535_v8  ;;  %v2401_v38 = vld [vmem:[#allocation15 + $0xe8] sm:$0xf]  ;;  %v2578_v39 = vld [vmem:[#allocation15 + $0xf4] sm:$0xf0]  ;;  %v2394_v40 = vor.u32 %v2577_v37, %v2393_v36  ;;  %v2576_v42 = vld [vmem:[#allocation15 + $0xec] sm:$0xf] }
  0x5f   : > { %v2402_v41 = vor.u32 %v2578_v39, %v2401_v38  ;;  %v2403_v43 = vld [vmem:[#allocation15 + $0xf8] sm:$0xf0]  ;;  %v2377_v45 = vld [vmem:[#allocation15 + $0xc0] sm:$0xf]  ;;  %v2573_v46 = vld [vmem:[#allocation15 + $0xcc] sm:$0xf0] }
  0x60   : > { %949 = vmatpush.bf16.msra.mxu0 %v2511_v4  ;;  %v2406_v44 = vor.u32 %v2576_v42, %v2403_v43  ;;  %v2385_v47 = vld [vmem:[#allocation15 + $0xc8] sm:$0xf]  ;;  %v2378_v48 = vor.u32 %v2573_v46, %v2377_v45  ;;  %v2574_v49 = vld [vmem:[#allocation15 + $0xd4] sm:$0xf0]  ;;  %v2572_v50 = vld [vmem:[#allocation15 + $0xcc] sm:$0xf] }
  0x61   : > { %1038 = vmatpush.bf16.msra.mxu1 %v2519_v10  ;;  %v2387_v51 = vld [vmem:[#allocation15 + $0xd8] sm:$0xf0]  ;;  %v2527_v52 = vld [vmem:[#allocation6 + $0x28] sm:$0xff]  ;;  %v2386_v53 = vor.u32 %v2574_v49, %v2385_v47  ;;  %v2569_v56 = vld [vmem:[#allocation15 + $0xac] sm:$0xf0] }
  0x62   : > { %1227 = vmatpush.bf16.msra.mxu3 %v2534_v12  ;;  %v2390_v54 = vor.u32 %v2572_v50, %v2387_v51  ;;  %v2361_v55 = vld [vmem:[#allocation15 + $0xa0] sm:$0xf]  ;;  %v2369_v57 = vld [vmem:[#allocation15 + $0xa8] sm:$0xf]  ;;  %v2570_v58 = vld [vmem:[#allocation15 + $0xb4] sm:$0xf0]  ;;  %1127 = vmatpush.bf16.msra.mxu2 %v2527_v52 }
  0x63   : > { %v2568_v59 = vld [vmem:[#allocation15 + $0xac] sm:$0xf]  ;;  %v2371_v60 = vld [vmem:[#allocation15 + $0xb8] sm:$0xf0]  ;;  %v2362_v61 = vor.u32 %v2569_v56, %v2361_v55  ;;  %v2370_v62 = vor.u32 %v2570_v58, %v2369_v57  ;;  %v2756_v2 = vld [vmem:[#allocation2] ss:$0 sm:$0xff] }
  0x64   : > { %950 = vmatpush.bf16.msra.mxu0 %v2510_v7  ;;  %v2526_v0 = vld [vmem:[#allocation6 + $0x20] sm:$0xff]  ;;  %v2374_v1 = vor.u32 %v2568_v59, %v2371_v60  ;;  %v2525_v3 = vld [vmem:[#allocation6 + $0x18] sm:$0xff]  ;;  %v2524_v8 = vld [vmem:[#allocation6 + $0x10] sm:$0xff] }
  0x65   : > { %1039 = vmatpush.bf16.msra.mxu1 %v2518_v13  ;;  %v2757_v5 = vld [vmem:[#allocation10] ss:$0 sm:$0xff]  ;;  %v2523_v13 = vld [vmem:[#allocation6 + $0x8] sm:$0xff]  ;;  %v2379_v38 = vld [vmem:[#allocation15 + $0xd0] sm:$0xf0] }
  0x66   : > { %1228 = vmatpush.bf16.msra.mxu3 %v2533_v15  ;;  %1128 = vmatpush.bf16.msra.mxu2 %v2526_v0  ;;  %v2355_v34 = vld [vmem:[#allocation15 + $0x98] sm:$0xf0]  ;;  %v2571_v37 = vld [vmem:[#allocation15 + $0xc4] sm:$0xf]  ;;  %v2337_v42 = vld [vmem:[#allocation15 + $0x68] sm:$0xf] }
  0x67   : > { %v2382_v39 = vor.u32 %v2571_v37, %v2379_v38  ;;  %v2560_v45 = vld [vmem:[#allocation15 + $0x6c] sm:$0xf]  ;;  %v2339_v46 = vld [vmem:[#allocation15 + $0x78] sm:$0xf0]  ;;  %v2567_v49 = vld [vmem:[#allocation15 + $0xa4] sm:$0xf] }
  0x68   : > { %951 = vmatpush.bf16.msra.mxu0 %v2509_v11  ;;  %v2363_v50 = vld [vmem:[#allocation15 + $0xb0] sm:$0xf0]  ;;  %v2313_v52 = vld [vmem:[#allocation15 + $0x40] sm:$0xf]  ;;  %v2558_v56 = vld [vmem:[#allocation15 + $0x54] sm:$0xf0] }
  0x69   : > { %1040 = vmatpush.bf16.msra.mxu1 %v2517_v25  ;;  %v2575_v25 = vld [vmem:[#allocation15 + $0xe4] sm:$0xf]  ;;  %v2366_v51 = vor.u32 %v2567_v49, %v2363_v50  ;;  %v2556_v57 = vld [vmem:[#allocation15 + $0x4c] sm:$0xf]  ;;  %v2323_v58 = vld [vmem:[#allocation15 + $0x58] sm:$0xf0] }
  0x6a   : > { %1229 = vmatpush.bf16.msra.mxu3 %v2532_v17  ;;  %1129 = vmatpush.bf16.msra.mxu2 %v2525_v3  ;;  %v2326_v60 = vor.u32 %v2556_v57, %v2323_v58  ;;  %v2297_v0 = vld [vmem:[#allocation15 + $0x20] sm:$0xf]  ;;  %v2579_v57 = vld [vmem:[#allocation18] sm:$0xff]  ;;  %v2594_v58 = vld [vmem:[%s3607_s16 + $0x38] sm:$0xff] }
  0x6b   : > { %v2586_v50 = vld [vmem:[#allocation18 + $0x38] sm:$0xff] }
  0x6c   : > { %952 = vmatpush.bf16.msra.mxu0 %v2508_v14 }
  0x6d   : > { %1041 = vmatpush.bf16.msra.mxu1 %v2516_v27 }
  0x6e   : > { %1230 = vmatpush.bf16.msra.mxu3 %v2531_v19  ;;  %1130 = vmatpush.bf16.msra.mxu2 %v2524_v8 }
  0x70   : > { %953 = vmatpush.bf16.msra.mxu0 %v2507_v16 }
  0x71   : > { %1231 = vmatmul.bf16.vlgmr.msra.gmra.mxu3 %v2530_v22  ;;  %1042 = vmatpush.bf16.msra.mxu1 %v2515_v29  ;;  %v2565_v29 = vld [vmem:[#allocation15 + $0x8c] sm:$0xf0] }
  0x72   : > { %1563 = vmatpush.bf16.msrb.mxu3 %v2402_v41  ;;  %1131 = vmatpush.bf16.msra.mxu2 %v2523_v13  ;;  %v2561_v41 = vld [vmem:[#allocation15 + $0x6c] sm:$0xf0] }
  0x73   : > { %v2549_v13 = vld [vmem:[#allocation15 + $0xc] sm:$0xf0] }
  0x74   : > { %954 = vmatpush.bf16.msra.mxu0 %v2506_v18 }
  0x75   : > { %1043 = vmatpush.bf16.msra.mxu1 %v2514_v31 }
  0x76   : > { %1564 = vmatpush.bf16.msrb.mxu3 %v2386_v53  ;;  %v2557_v53 = vld [vmem:[#allocation15 + $0x4c] sm:$0xf0] }
  0x77   : > { %955 = vmatmul.bf16.vlgmr.msra.gmra.mxu0 %v2505_v21  ;;  %v2314_v55 = vor.u32 %v2557_v53, %v2313_v52  ;;  %v2584_v52 = vld [vmem:[#allocation18 + $0x28] sm:$0xff]  ;;  %v2583_v53 = vld [vmem:[#allocation18 + $0x20] sm:$0xff] }
  0x78   : > { %1312 = vmatpush.bf16.msrb.mxu0 %v2546_v20 }
  0x79   : > { %1535 = vmatpush.bf16.msrb.mxu1 %v2394_v40  ;;  %v2329_v40 = vld [vmem:[#allocation15 + $0x60] sm:$0xf] }
  0x7a   : > { %1565 = vmatpush.bf16.msrb.mxu3 %v2370_v62  ;;  %v2330_v43 = vor.u32 %v2561_v41, %v2329_v40  ;;  %v2347_v62 = vld [vmem:[#allocation15 + $0x90] sm:$0xf0] }
  0x7c   : > { %1313 = vmatpush.bf16.msrb.mxu0 %v2545_v23 }
  0x7d   : > { %1536 = vmatpush.bf16.msrb.mxu1 %v2378_v48  ;;  %v2342_v48 = vor.u32 %v2560_v45, %v2339_v46 }
  0x80   : > { %1314 = vmatpush.bf16.msrb.mxu0 %v2544_v24  ;;  %v2522_v24 = vld [vmem:[#allocation6] sm:$0xff] }
  0x81   : > { %1537 = vmatpush.bf16.msrb.mxu1 %v2362_v61  ;;  %1132 = vmatpush.bf16.msra.mxu2 %v2522_v24  ;;  %v2563_v61 = vld [vmem:[#allocation15 + $0x84] sm:$0xf] }
  0x82   : > { %v2551_v24 = vld [vmem:[#allocation15 + $0x24] sm:$0xf] }
  0x84   : > { %1315 = vmatpush.bf16.msrb.mxu0 %v2543_v26  ;;  %v2395_v26 = vld [vmem:[#allocation15 + $0xf0] sm:$0xf0] }
  0x85   : > { %v2398_v27 = vor.u32 %v2575_v25, %v2395_v26  ;;  %v2299_v25 = vld [vmem:[#allocation15 + $0x30] sm:$0xf0]  ;;  %v2547_v26 = vld [vmem:[#allocation15 + $0x4] sm:$0xf] }
  0x87   : > { %1549 = vmatpush.bf16.msrb.mxu2 %v2398_v27  ;;  %v2302_v27 = vor.u32 %v2551_v24, %v2299_v25  ;;  %v2592_v25 = vld [vmem:[%s3607_s16 + $0x28] sm:$0xff] }
  0x88   : > { %1316 = vmatpush.bf16.msrb.mxu0 %v2542_v28  ;;  %v2345_v28 = vld [vmem:[#allocation15 + $0x80] sm:$0xf] }
  0x89   : > { %v2346_v31 = vor.u32 %v2565_v29, %v2345_v28  ;;  %v2283_v28 = vld [vmem:[#allocation15 + $0x10] sm:$0xf0] }
  0x8a   : > { %v2286_v29 = vor.u32 %v2547_v26, %v2283_v28  ;;  %v2591_v26 = vld [vmem:[%s3607_s16 + $0x20] sm:$0xff]  ;;  %v2589_v28 = vld [vmem:[%s3607_s16 + $0x10] sm:$0xff] }
  0x8b   : > { %1538 = vmatpush.bf16.msrb.mxu1 %v2346_v31  ;;  %1550 = vmatpush.bf16.msrb.mxu2 %v2382_v39  ;;  %v2758_v31 = vld [vmem:[#allocation4] ss:$0 sm:$0xff] }
  0x8c   : > { %1317 = vmatpush.bf16.msrb.mxu0 %v2541_v30  ;;  %v2353_v30 = vld [vmem:[#allocation15 + $0x88] sm:$0xf] }
  0x8f   : > { %1539 = vmatpush.bf16.msrb.mxu1 %v2330_v43  ;;  %1551 = vmatpush.bf16.msrb.mxu2 %v2366_v51  ;;  %v2585_v51 = vld [vmem:[#allocation18 + $0x30] sm:$0xff] }
  0x90   : > { %1318 = vmatpush.bf16.msrb.mxu0 %v2540_v32  ;;  %v2566_v32 = vld [vmem:[#allocation15 + $0x94] sm:$0xf0] }
  0x91   : > { %v2354_v35 = vor.u32 %v2566_v32, %v2353_v30 }
  0x93   : > { %1566 = vmatpush.bf16.msrb.mxu3 %v2354_v35  ;;  %1540 = vmatpush.bf16.msrb.mxu1 %v2314_v55  ;;  %v2581_v55 = vld [vmem:[#allocation18 + $0x10] sm:$0xff] }
  0x94   : > { %1319 = vmatpush.bf16.msrb.mxu0 %v2539_v33  ;;  %v2564_v33 = vld [vmem:[#allocation15 + $0x8c] sm:$0xf] }
  0x95   : > { %v2358_v36 = vor.u32 %v2564_v33, %v2355_v34  ;;  %v2759_v34 = vld [vmem:[#allocation13] ss:$0 sm:$0xff] }
  0x98   : > { %1577 = vmatpush.bf16.msra.mxu0 %v2406_v44  ;;  %v2562_v44 = vld [vmem:[#allocation15 + $0x74] sm:$0xf0] }
  0x99   : > { %v2338_v47 = vor.u32 %v2562_v44, %v2337_v42 }
  0x9b   : > { %1567 = vmatpush.bf16.msrb.mxu3 %v2338_v47 }
  0x9c   : > { %1578 = vmatpush.bf16.msra.mxu0 %v2390_v54  ;;  %v2321_v54 = vld [vmem:[#allocation15 + $0x48] sm:$0xf] }
  0x9d   : > { %v2322_v59 = vor.u32 %v2558_v56, %v2321_v54  ;;  %v2582_v54 = vld [vmem:[#allocation18 + $0x18] sm:$0xff]  ;;  %v2580_v56 = vld [vmem:[#allocation18 + $0x8] sm:$0xff] }
  0x9f   : > { %1568 = vmatpush.bf16.msrb.mxu3 %v2322_v59 }
  0xa0   : > { %1579 = vmatpush.bf16.msra.mxu0 %v2374_v1  ;;  %v2553_v1 = vld [vmem:[#allocation15 + $0x2c] sm:$0xf0] }
  0xa1   : > { %v2298_v3 = vor.u32 %v2553_v1, %v2297_v0 }
  0xa3   : > { %1541 = vmatpush.bf16.msrb.mxu1 %v2298_v3 }
  0xa4   : > { %1580 = vmatpush.bf16.msra.mxu0 %v2358_v36 }
  0xa8   : > { %1581 = vmatpush.bf16.msra.mxu0 %v2342_v48 }
  0xac   : > { %1582 = vmatpush.bf16.msra.mxu0 %v2326_v60  ;;  %v2593_v60 = vld [vmem:[%s3607_s16 + $0x30] sm:$0xff] }
  0xf4   : > { %v956_v63 = vpop.f32.mrf.mxu0  ;;  %v1232_v6 = vpop.f32.mrf.mxu3 }
  0xf5   : > { %v957_v4 = vadd.f32 %v2756_v2, %v956_v63  ;;  %v1233_v10 = vadd.f32 %v2757_v5, %v1232_v6  ;;  %v2350_v63 = vor.u32 %v2563_v61, %v2347_v62  ;;  %v2307_v6 = vld [vmem:[#allocation15 + $0x38] sm:$0xf0]  ;;  %v2760_v61 = vld [vmem:[#allocation7] ss:$0 sm:$0xff] }
  0xf7   : > { %v963_v9 = vmul.f32 0.2, %v957_v4  ;;  %vm961_vm0 = vcmp.gt.f32.partialorder %v957_v4, 0.0  ;;  %v1239_v14 = vmul.f32 0.2, %v1233_v10  ;;  %vm1237_vm2 = vcmp.gt.f32.partialorder %v1233_v10, 0.0  ;;  %1552 = vmatpush.bf16.msrb.mxu2 %v2350_v63 }
  0xf9   : > { %v965_v15 = vsel %vm961_vm0, %v957_v4, %v963_v9  ;;  %v1241_v21 = vsel %vm1237_vm2, %v1233_v10, %v1239_v14  ;;  %v2554_v4 = vld [vmem:[#allocation15 + $0x34] sm:$0xf0]  ;;  %v2559_v9 = vld [vmem:[#allocation15 + $0x64] sm:$0xf]  ;;  %v2331_v10 = vld [vmem:[#allocation15 + $0x70] sm:$0xf0] }
  0xfa   : > { %v2289_v14 = vld [vmem:[#allocation15 + $0x8] sm:$0xf] }
  0xfc   : > { %v958_v7 = vpop.f32.mrf.mxu0  ;;  %v1234_v17 = vpop.f32.mrf.mxu3 }
  0xfd   : > { %v959_v11 = vadd.f32 %v2756_v2, %v958_v7  ;;  %v1235_v19 = vadd.f32 %v2757_v5, %v1234_v17  ;;  %v2305_v2 = vld [vmem:[#allocation15 + $0x28] sm:$0xf]  ;;  %v2552_v5 = vld [vmem:[#allocation15 + $0x2c] sm:$0xf] }
  0xfe   : > { %v2306_v7 = vor.u32 %v2554_v4, %v2305_v2  ;;  %v2310_v8 = vor.u32 %v2552_v5, %v2307_v6  ;;  %v2548_v17 = vld [vmem:[#allocation15 + $0xc] sm:$0xf]  ;;  %v3557_v6 = vld [vmem:[#allocation16] sm:$0xf] }
  0xff   : > { %v964_v12 = vmul.f32 0.2, %v959_v11  ;;  %vm962_vm1 = vcmp.gt.f32.partialorder %v959_v11, 0.0  ;;  %vm1238_vm3 = vcmp.gt.f32.partialorder %v1235_v19, 0.0  ;;  %v1240_v20 = vmul.f32 0.2, %v1235_v19 }
 0x100   : > { %1569 = vmatpush.bf16.msrb.mxu3 %v2306_v7  ;;  %1583 = vmatpush.bf16.msra.mxu0 %v2310_v8 }
 0x101   : > { %v966_v16 = vsel %vm962_vm1, %v959_v11, %v964_v12  ;;  %v1242_v22 = vsel %vm1238_vm3, %v1235_v19, %v1240_v20  ;;  %v2334_v11 = vor.u32 %v2559_v9, %v2331_v10  ;;  %v2281_v12 = vld [vmem:[#allocation15] sm:$0xf]  ;;  %v1367_v10 = vperm.slane %v3557_v6, 0 }
 0x102   : > { %v967_v18 = vpack.c.bf16 %v966_v16, %v965_v15  ;;  %v1243_v23 = vpack.c.bf16 %v1242_v22, %v1241_v21  ;;  %v2282_v15 = vor.u32 %v2549_v13, %v2281_v12  ;;  %v2550_v16 = vld [vmem:[#allocation15 + $0x14] sm:$0xf0]  ;;  %v2555_v21 = vld [vmem:[#allocation15 + $0x44] sm:$0xf]  ;;  %v2315_v22 = vld [vmem:[#allocation15 + $0x50] sm:$0xf0] }
 0x103   : > { %1553 = vmatpush.bf16.msrb.mxu2 %v2334_v11  ;;  %v2290_v19 = vor.u32 %v2550_v16, %v2289_v14  ;;  %v1368_v11 = vperm.slane %v3557_v6, 1 }
 0x104   : > { %1044 = vmatmul.bf16.vlgmr.msra.gmra.mxu1 %v967_v18  ;;  %1320 = vmatmul.bf16.vlgmr.msrb.gmra.mxu0 %v1243_v23  ;;  %v2291_v18 = vld [vmem:[#allocation15 + $0x18] sm:$0xf0]  ;;  %v2318_v23 = vor.u32 %v2555_v21, %v2315_v22 }
 0x105   : > { %v2294_v20 = vor.u32 %v2548_v17, %v2291_v18  ;;  %1542 = vmatpush.bf16.msrb.mxu1 %v2282_v15  ;;  %1570 = vmatpush.bf16.msrb.mxu3 %v2290_v19 }
 0x107   : > { %1584 = vmatpush.bf16.msra.mxu0 %v2294_v20  ;;  %1554 = vmatpush.bf16.msrb.mxu2 %v2318_v23 }
 0x109   : > { %1666 = vmatpush.bf16.msra.mxu1 %v2586_v50  ;;  %v1370_v50 = vperm.slane %v3557_v6, 3 }
 0x10b   : > { %1555 = vmatpush.bf16.msrb.mxu2 %v2302_v27  ;;  %v2590_v27 = vld [vmem:[%s3607_s16 + $0x18] sm:$0xff] }
 0x10d   : > { %1667 = vmatpush.bf16.msra.mxu1 %v2585_v51 }
 0x10f   : > { %1556 = vmatpush.bf16.msrb.mxu2 %v2286_v29  ;;  %v2588_v29 = vld [vmem:[%s3607_s16 + $0x8] sm:$0xff] }
 0x111   : > { %1668 = vmatpush.bf16.msra.mxu1 %v2584_v52 }
 0x115   : > { %1669 = vmatpush.bf16.msra.mxu1 %v2583_v53 }
 0x119   : > { %1670 = vmatpush.bf16.msra.mxu1 %v2582_v54 }
 0x11d   : > { %1671 = vmatpush.bf16.msra.mxu1 %v2581_v55 }
 0x121   : > { %1672 = vmatpush.bf16.msra.mxu1 %v2580_v56 }
 0x125   : > { %1673 = vmatpush.bf16.msra.mxu1 %v2579_v57 }
 0x181   : > { %v1045_v30 = vpop.f32.mrf.mxu1  ;;  %v1321_v33 = vpop.f32.mrf.mxu0 }
 0x182   : > { %v1046_v32 = vadd.f32 %v2758_v31, %v1045_v30  ;;  %v1322_v38 = vadd.f32 %v2759_v34, %v1321_v33  ;;  %v2587_v30 = vld [vmem:[%s3607_s16] sm:$0xff]  ;;  %v2761_v33 = vld [vmem:[#allocation19] ss:$0 sm:$0xff] }
 0x184   : > { %v1052_v36 = vmul.f32 0.2, %v1046_v32  ;;  %vm1050_vm4 = vcmp.gt.f32.partialorder %v1046_v32, 0.0  ;;  %v1328_v44 = vmul.f32 0.2, %v1322_v38  ;;  %vm1326_vm6 = vcmp.gt.f32.partialorder %v1322_v38, 0.0 }
 0x186   : > { %v1054_v40 = vsel %vm1050_vm4, %v1046_v32, %v1052_v36  ;;  %v1330_v47 = vsel %vm1326_vm6, %v1322_v38, %v1328_v44  ;;  %v2601_v32 = vld [vmem:[#allocation22 + $0x30] sm:$0xff] }
 0x189   : > { %v1047_v35 = vpop.f32.mrf.mxu1  ;;  %v1323_v42 = vpop.f32.mrf.mxu0 }
 0x18a   : > { %v1048_v37 = vadd.f32 %v2758_v31, %v1047_v35  ;;  %v1324_v45 = vadd.f32 %v2759_v34, %v1323_v42  ;;  %v2602_v31 = vld [vmem:[#allocation22 + $0x38] sm:$0xff]  ;;  %v2600_v34 = vld [vmem:[#allocation22 + $0x28] sm:$0xff] }
 0x18b   : > { %1852 = vmatpush.bf16.msra.mxu3 %v2602_v31 }
 0x18c   : > { %v1053_v39 = vmul.f32 0.2, %v1048_v37  ;;  %vm1051_vm5 = vcmp.gt.f32.partialorder %v1048_v37, 0.0  ;;  %vm1327_vm7 = vcmp.gt.f32.partialorder %v1324_v45, 0.0  ;;  %v1329_v46 = vmul.f32 0.2, %v1324_v45 }
 0x18e   : > { %v1055_v41 = vsel %vm1051_vm5, %v1048_v37, %v1053_v39  ;;  %v1331_v48 = vsel %vm1327_vm7, %v1324_v45, %v1329_v46  ;;  %v2599_v37 = vld [vmem:[#allocation22 + $0x20] sm:$0xff]  ;;  %v1369_v45 = vperm.slane %v3557_v6, 2 }
 0x18f   : > { %v1056_v43 = vpack.c.bf16 %v1055_v41, %v1054_v40  ;;  %v1332_v49 = vpack.c.bf16 %v1331_v48, %v1330_v47  ;;  %1853 = vmatpush.bf16.msra.mxu3 %v2601_v32 }
 0x191   : > { %1133 = vmatmul.bf16.vlgmr.msra.gmra.mxu2 %v1056_v43  ;;  %1543 = vmatmul.bf16.vlgmr.msrb.gmra.mxu1 %v1332_v49 }
 0x192   : > { %1571 = vmatmul.bf16.vlgmr.msrb.gmra.mxu3 %v1332_v49  ;;  %1585 = vmatmul.bf16.vlgmr.msra.gmra.mxu0 %v1332_v49 }
 0x193   : > { %1763 = vmatpush.bf16.msra.mxu2 %v2594_v58  ;;  %1854 = vmatpush.bf16.msra.mxu3 %v2600_v34 }
 0x197   : > { %1764 = vmatpush.bf16.msra.mxu2 %v2593_v60  ;;  %1855 = vmatpush.bf16.msra.mxu3 %v2599_v37 }
 0x19b   : > { %1765 = vmatpush.bf16.msra.mxu2 %v2592_v25 }
 0x19f   : > { %1766 = vmatpush.bf16.msra.mxu2 %v2591_v26 }
 0x1a1   : > { %1557 = vmatmul.bf16.vlgmr.msrb.gmra.mxu2 %v1332_v49 }
 0x1a3   : > { %1767 = vmatpush.bf16.msra.mxu2 %v2590_v27 }
 0x1a7   : > { %1768 = vmatpush.bf16.msra.mxu2 %v2589_v28 }
 0x1ab   : > { %1769 = vmatpush.bf16.msra.mxu2 %v2588_v29 }
 0x1af   : > { %1770 = vmatpush.bf16.msra.mxu2 %v2587_v30 }
 0x20e   : > { %v1544_v2 = vpop.f32.mrf.mxu1 }
 0x20f   : > { %v1545_v15 = vadd.f32 %v1544_v2, %v1367_v10  ;;  %v1586_v40 = vpop.f32.mrf.mxu0  ;;  %v2595_v2 = vld [vmem:[#allocation22] sm:$0xff] }
 0x210   : > { %v1587_v57 = vadd.f32 %v1586_v40, %v1370_v50 }
 0x214   : > { %v1134_v59 = vpop.f32.mrf.mxu2 }
 0x215   : > { %v1135_v62 = vadd.f32 %v2760_v61, %v1134_v59  ;;  %v1572_v38 = vpop.f32.mrf.mxu3 }
 0x216   : > { %v1546_v12 = vpop.f32.mrf.mxu1  ;;  %v1573_v51 = vadd.f32 %v1572_v38, %v1369_v45 }
 0x217   : > { %v1141_v1 = vmul.f32 0.2, %v1135_v62  ;;  %vm1139_vm8 = vcmp.gt.f32.partialorder %v1135_v62, 0.0  ;;  %v1547_v16 = vadd.f32 %v1546_v12, %v1367_v10  ;;  %v1588_v53 = vpop.f32.mrf.mxu0 }
 0x218   : > { %v1589_v58 = vadd.f32 %v1588_v53, %v1370_v50 }
 0x219   : > { %v1143_v4 = vsel %vm1139_vm8, %v1135_v62, %v1141_v1  ;;  %v2596_v1 = vld [vmem:[#allocation22 + $0x8] sm:$0xff] }
 0x21a   : > { %v1145_v8 = vpack.c.bf16 %v1143_v4, %v1143_v4  ;;  %v2762_v4 = vld [vmem:[#allocation21] ss:$0 sm:$0xff] }
 0x21c   : > { %v1136_v63 = vpop.f32.mrf.mxu2  ;;  %v1591_v13 = vunpack.c.l.bf16 %v1145_v8 }
 0x21d   : > { %v1137_v0 = vadd.f32 %v2760_v61, %v1136_v63  ;;  %v1574_v48 = vpop.f32.mrf.mxu3  ;;  %v2598_v63 = vld [vmem:[#allocation22 + $0x18] sm:$0xff] }
 0x21e   : > { %v1593_v19 = vmul.f32 %v1591_v13, %v1545_v15  ;;  %v1575_v54 = vadd.f32 %v1574_v48, %v1369_v45  ;;  %1856 = vmatpush.bf16.msra.mxu3 %v2598_v63  ;;  %v2763_v13 = vld [vmem:[%s3610_s19] ss:$0 sm:$0xff] }
 0x21f   : > { %vm1140_vm9 = vcmp.gt.f32.partialorder %v1137_v0, 0.0  ;;  %v1142_v3 = vmul.f32 0.2, %v1137_v0 }
 0x221   : > { %v1144_v5 = vsel %vm1140_vm9, %v1137_v0, %v1142_v3  ;;  %v2597_v0 = vld [vmem:[#allocation22 + $0x10] sm:$0xff] }
 0x222   : > { %v1146_v9 = vpack.c.bf16 %v1144_v5, %v1144_v5  ;;  %1857 = vmatpush.bf16.msra.mxu3 %v2597_v0 }
 0x224   : > { %v1558_v7 = vpop.f32.mrf.mxu2  ;;  %v1592_v14 = vunpack.c.l.bf16 %v1146_v9 }
 0x225   : > { %v1559_v17 = vadd.f32 %v1558_v7, %v1368_v11 }
 0x226   : > { %v1594_v20 = vmul.f32 %v1592_v14, %v1547_v16  ;;  %1858 = vmatpush.bf16.msra.mxu3 %v2596_v1 }
 0x227   : > { %v1595_v22 = vadd.f32 %v1593_v19, %v1559_v17 }
 0x22a   : > { %1859 = vmatpush.bf16.msra.mxu3 %v2595_v2 }
 0x22c   : > { %v1560_v18 = vpop.f32.mrf.mxu2 }
 0x22d   : > { %v1561_v21 = vadd.f32 %v1560_v18, %v1368_v11 }
 0x22f   : > { %v1596_v23 = vadd.f32 %v1594_v20, %v1561_v21 }
 0x231   : > { %v1597_v24 = vpack.c.bf16 %v1596_v23, %v1595_v22 }
 0x233   : > { %1674 = vmatmul.bf16.vlgmr.msra.gmra.mxu1 %v1597_v24 }
 0x2b0   : > { %v1675_v35 = vpop.f32.mrf.mxu1 }
 0x2b1   : > { %v1676_v36 = vadd.f32 %v2761_v33, %v1675_v35 }
 0x2b3   : > { %vm1680_vm10 = vcmp.gt.f32.partialorder %v1676_v36, 0.0  ;;  %v1682_v39 = vmul.f32 0.2, %v1676_v36 }
 0x2b5   : > { %v1684_v41 = vsel %vm1680_vm10, %v1676_v36, %v1682_v39 }
 0x2b6   : > { %v1686_v42 = vpack.c.bf16 %v1684_v41, %v1684_v41 }
 0x2b8   : > { %v1677_v43 = vpop.f32.mrf.mxu1  ;;  %v1688_v47 = vunpack.c.l.bf16 %v1686_v42 }
 0x2b9   : > { %v1678_v44 = vadd.f32 %v2761_v33, %v1677_v43 }
 0x2ba   : > { %v1690_v55 = vmul.f32 %v1688_v47, %v1573_v51 }
 0x2bb   : > { %vm1681_vm11 = vcmp.gt.f32.partialorder %v1678_v44, 0.0  ;;  %v1683_v46 = vmul.f32 0.2, %v1678_v44 }
 0x2bc   : > { %v1692_v60 = vadd.f32 %v1690_v55, %v1587_v57 }
 0x2bd   : > { %v1685_v49 = vsel %vm1681_vm11, %v1678_v44, %v1683_v46 }
 0x2be   : > { %v1687_v52 = vpack.c.bf16 %v1685_v49, %v1685_v49 }
 0x2c0   : > { %v1689_v56 = vunpack.c.l.bf16 %v1687_v52 }
 0x2c2   : > { %v1691_v59 = vmul.f32 %v1689_v56, %v1575_v54 }
 0x2c4   : > { %v1693_v61 = vadd.f32 %v1691_v59, %v1589_v58 }
 0x2c6   : > { %v1694_v62 = vpack.c.bf16 %v1693_v61, %v1692_v60 }
 0x2c8   : > { %1771 = vmatmul.bf16.vlgmr.msra.gmra.mxu2 %v1694_v62 }
 0x34b   : > { %v1772_v3 = vpop.f32.mrf.mxu2 }
 0x34c   : > { %v1773_v5 = vadd.f32 %v2762_v4, %v1772_v3 }
 0x34e   : > { %v1779_v7 = vmul.f32 0.2, %v1773_v5  ;;  %vm1777_vm12 = vcmp.gt.f32.partialorder %v1773_v5, 0.0 }
 0x350   : > { %v1781_v10 = vsel %vm1777_vm12, %v1773_v5, %v1779_v7 }
 0x353   : > { %v1774_v6 = vpop.f32.mrf.mxu2 }
 0x354   : > { %v1775_v8 = vadd.f32 %v2762_v4, %v1774_v6 }
 0x356   : > { %vm1778_vm13 = vcmp.gt.f32.partialorder %v1775_v8, 0.0  ;;  %v1780_v9 = vmul.f32 0.2, %v1775_v8 }
 0x358   : > { %v1782_v11 = vsel %vm1778_vm13, %v1775_v8, %v1780_v9 }
 0x359   : > { %v1783_v12 = vpack.c.bf16 %v1782_v11, %v1781_v10 }
 0x35b   : > { %1860 = vmatmul.bf16.vlgmr.msra.gmra.mxu3 %v1783_v12 }
 0x3de   : > { %v1861_v14 = vpop.f32.mrf.mxu3 }
 0x3df   : > { %v1862_v15 = vadd.f32 %v2763_v13, %v1861_v14 }
 0x3e1   : > { %1866 = vst [vmem:[%s869_s2] sm:$0xff] %v1862_v15 }
 0x3e6   : > { %v1863_v16 = vpop.f32.mrf.mxu3 }
 0x3e7   : > { %v1864_v17 = vadd.f32 %v2763_v13, %v1863_v16 }
 0x3e9   : > { %1867 = vst [vmem:[%s869_s2 + $0x8] sm:$0xff] %v1864_v17 }
 0x3ea PF: > { %s38_s1 = sadd.s32 1, %s3222_s1  }
 0x3eb   : > { %p35_p7 = scmp.ge.s32.totalorder %s38_s1, 5  }
 0x3ed   :  { %37 = sbr.rel (!%p35_p7) target bundleno = 19 (0x13), region = 190 }
 0x3f2   :  { %1890 = vsyncpa [#allocation3], 1 }
 0x3f3   :  { %1892 = vsyncpa [#allocation3 + $0x1], 1 }
 0x3f4   :  { %1893 = vsyncpa [#allocation5], 1 }
 0x3f5   :  { %1894 = vsyncpa [#allocation8], 1 }
 0x3f6   :  { %1895 = vsyncpa [#allocation11], 1 }
 0x3f7   :  { %1896 = vsyncpa [#allocation14], 1 }
 0x3f8   :  { %1897 = vsyncpa [#allocation17], 1 }
 0x3f9   :  { %1898 = vsyncpa [#allocation20], 1 }
 0x3fa   :  { %1899 = vsyncpa [#allocation23], 1 }

// kernel: film_forward.1
= control target key start
LH: loop header
LB: loop body
LE: loop exit
PB: predicated region body
PF: predicated region fallthrough
CT: control target
= control target key end

     0   :  { %s3591_s0 = inlined_call_operand.vmem [shape: bf16[48,128], index: 0, kind: input, shape index: {}]   ;;  %s3592_s1 = inlined_call_operand.vmem [shape: bf16[48,128], index: 1, kind: input, shape index: {}]   ;;  %s3593_s2 = inlined_call_operand.vmem [shape: bf16[128,128], index: 2, kind: input, shape index: {}]   ;;  %s3594_s3 = inlined_call_operand.hbm [shape: f32[1,128], index: 3, kind: input, shape index: {}]   ;;  %s3595_s4 = inlined_call_operand.vmem [shape: bf16[128,128], index: 4, kind: input, shape index: {}]   ;;  %s3596_s5 = inlined_call_operand.hbm [shape: f32[1,128], index: 5, kind: input, shape index: {}]   ;;  %s3597_s6 = inlined_call_operand.hbm [shape: bf16[128,128], index: 6, kind: input, shape index: {}]   ;;  %s3598_s7 = inlined_call_operand.hbm [shape: f32[1,128], index: 7, kind: input, shape index: {}]   ;;  %s3599_s8 = inlined_call_operand.hbm [shape: bf16[128,128], index: 8, kind: input, shape index: {}]   ;;  %s3600_s9 = inlined_call_operand.hbm [shape: f32[1,128], index: 9, kind: input, shape index: {}]   ;;  %s3601_s10 = inlined_call_operand.hbm [shape: bf16[128,128], index: 10, kind: input, shape index: {}]   ;;  %s3602_s11 = inlined_call_operand.hbm [shape: f32[1,128], index: 11, kind: input, shape index: {}]   ;;  %s3603_s12 = inlined_call_operand.hbm [shape: bf16[128,512], index: 12, kind: input, shape index: {}]   ;;  %s3604_s13 = inlined_call_operand.hbm [shape: f32[1,512], index: 13, kind: input, shape index: {}]   ;;  %s3605_s14 = inlined_call_operand.hbm [shape: bf16[128,128], index: 14, kind: input, shape index: {}]   ;;  %s3606_s15 = inlined_call_operand.hbm [shape: f32[1,128], index: 15, kind: input, shape index: {}]   ;;  %s3607_s16 = inlined_call_operand.vmem [shape: bf16[128,128], index: 16, kind: input, shape index: {}]   ;;  %s3608_s17 = inlined_call_operand.hbm [shape: f32[1,128], index: 17, kind: input, shape index: {}]   ;;  %s3609_s18 = inlined_call_operand.hbm [shape: bf16[128,128], index: 18, kind: input, shape index: {}]   ;;  %s3610_s19 = inlined_call_operand.vmem [shape: f32[1,128], index: 19, kind: input, shape index: {}]   ;;  %s3611_s20 = inlined_call_operand.vmem [shape: f32[48,128], index: 20, kind: output, shape index: {}]  }
   0x1   :  { %3615 = sst [smem:[#allocation32_spill]] %s3591_s0 }
   0x2   :  { %3616 = sst [smem:[#allocation33_spill]] %s3592_s1 }
   0x3   :  { %3617 = sst [smem:[#allocation34_spill]] %s3593_s2 }
   0x4   :  { %3618 = sst [smem:[#allocation35_spill]] %s3594_s3 }
   0x5   :  { %3619 = sst [smem:[#allocation36_spill]] %s3595_s4 }
   0x6   :  { %3620 = sst [smem:[#allocation37_spill]] %s3596_s5 }
   0x7   :  { %3621 = sst [smem:[#allocation38_spill]] %s3597_s6 }
   0x8   :  { %3622 = sst [smem:[#allocation39_spill]] %s3598_s7 }
   0x9   :  { %3623 = sst [smem:[#allocation40_spill]] %s3599_s8 }
   0xa   :  { %3624 = sst [smem:[#allocation41_spill]] %s3600_s9 }
   0xb   :  { %25 = vsyncpa [#allocation3], 0 }
   0xc   :  { %26 = vsyncpa [#allocation5], 0 }
   0xd   :  { %27 = vsyncpa [#allocation8], 0 }
   0xe   :  { %28 = vsyncpa [#allocation11], 0 }
   0xf   :  { %29 = vsyncpa [#allocation14], 0 }
  0x10   :  { %30 = vsyncpa [#allocation17], 0 }
  0x11   :  { %31 = vsyncpa [#allocation20], 0 }
  0x12   :  { %32 = vsyncpa [#allocation23], 0  ;;  %s3347_s1 = smov 0  }
  0x13 LB: > { %s3625_s5 = sld [smem:[#allocation37_spill]]  ;;  %s3614_s2 = sadd.s32 4294967295, %s3222_s1   ;;  %s3222_s1 = sphi %s3347_s1, %s38_s1  }
  0x14   : > { %p2074_p0 = scmp.ge.s32.totalorder %s3222_s1, 1  ;;  %p499_p1 = scmp.lt.s32.totalorder %s3222_s1, 4 }
  0x15   : > { %p3360_p2 = scmp.eq.s32.totalorder %s3614_s2, 0  ;;  %s3224_s26 = smov [#allocation4]  }
  0x16   : > { %p3364_p3 = pnand %p2074_p0, %p499_p1  ;;  %s531_s27 = sshll.u32 %s3224_s26, 4  ;;  %s532_s27 = int_to_ptr.vmem [resolvable:$true] %s531_s27 }
  0x17   : > { %s3628_s7 = sld [smem:[#allocation39_spill]]  ;;  %s3225_s23 = smov [#allocation7]  }
  0x18   : > { %p2659_p4 = pneg %p3364_p3  ;;  %s3629_s9 = sld [smem:[#allocation41_spill]] }
  0x19   : > { %s529_s24 = sshll.u32 %s3625_s5, 4  ;;  %s557_s26 = sshll.u32 %s3225_s23, 4  ;;  %s530_s24 = int_to_ptr.hbm [resolvable:$true] %s529_s24  ;;  %s558_s26 = int_to_ptr.vmem [resolvable:$true] %s557_s26 }
  0x1a   : > { %p3378_p5 = pnand %p3360_p2, %p2659_p4  ;;  %s3226_s28 = smov [#allocation10]  }
  0x1b   : > { %s583_s4 = sshll.u32 %s3226_s28, 4  ;;  %s607_s2 = sshll.u32 %s3602_s11, 4  ;;  %s584_s4 = int_to_ptr.vmem [resolvable:$true] %s583_s4  ;;  %s608_s2 = int_to_ptr.hbm [resolvable:$true] %s607_s2 }
  0x1c   : > { %2665 = dma.hbm_to_vmem [thread:$0]  (!%p3378_p5), %s530_s24, 16, %s532_s27, [#allocation5]  }
  0x1d   : > { %s555_s29 = sshll.u32 %s3628_s7, 4  ;;  %s633_s7 = sshll.u32 %s3604_s13, 4  ;;  %s556_s29 = int_to_ptr.hbm [resolvable:$true] %s555_s29  ;;  %s634_s7 = int_to_ptr.hbm [resolvable:$true] %s633_s7 }
  0x1e   : > { %s581_s21 = sshll.u32 %s3629_s9, 4  ;;  %s3227_s9 = smov [#allocation13]   ;;  %s582_s21 = int_to_ptr.hbm [resolvable:$true] %s581_s21 }
  0x1f   : > { %2671 = dma.hbm_to_vmem [thread:$0]  (!%p3378_p5), %s556_s29, 16, %s558_s26, [#allocation8]  }
  0x20   : > { %2677 = dma.hbm_to_vmem [thread:$0]  (!%p3378_p5), %s582_s21, 16, %s584_s4, [#allocation11]  }
  0x21   : > { %s609_s24 = sshll.u32 %s3227_s9, 4  ;;  %s3228_s27 = smov [#allocation16]   ;;  %s610_s24 = int_to_ptr.vmem [resolvable:$true] %s609_s24 }
  0x22   : > { %2683 = dma.hbm_to_vmem [thread:$0]  (!%p3378_p5), %s608_s2, 16, %s610_s24, [#allocation14]  }
  0x23   : > { %s635_s29 = sshll.u32 %s3228_s27, 4  ;;  %s659_s30 = sshll.u32 %s3606_s15, 4  ;;  %s636_s29 = int_to_ptr.vmem [resolvable:$true] %s635_s29  ;;  %s660_s30 = int_to_ptr.hbm [resolvable:$true] %s659_s30 }
  0x24   : > { %2689 = dma.hbm_to_vmem [thread:$0]  (!%p3378_p5), %s634_s7, 64, %s636_s29, [#allocation17]  }
  0x25   : > { %s3631_s4 = sld [smem:[#allocation35_spill]]  ;;  %s3229_s9 = smov [#allocation19]  }
  0x26   : > { %s661_s23 = sshll.u32 %s3229_s9, 4  ;;  %s3230_s2 = smov [#allocation2]   ;;  %s662_s23 = int_to_ptr.vmem [resolvable:$true] %s661_s23 }
  0x27   : > { %2695 = dma.hbm_to_vmem [thread:$0]  (!%p3378_p5), %s660_s30, 16, %s662_s23, [#allocation20]  }
  0x28   : > { %s516_s24 = sshll.u32 %s3230_s2, 4  ;;  %s3632_s6 = sld [smem:[#allocation38_spill]]  ;;  %s517_s24 = int_to_ptr.vmem [resolvable:$true] %s516_s24 }
  0x29   : > { %s3231_s7 = smov [#allocation6]   ;;  %s3633_s8 = sld [smem:[#allocation40_spill]] }
  0x2a   : > { %s542_s29 = sshll.u32 %s3231_s7, 4  ;;  %s3232_s30 = smov 64   ;;  %s543_s29 = int_to_ptr.vmem [resolvable:$true] %s542_s29 }
  0x2b   : > { %s514_s0 = sshll.u32 %s3631_s4, 4  ;;  %s3233_s9 = smov 4   ;;  %s515_s0 = int_to_ptr.hbm [resolvable:$true] %s514_s0 }
  0x2c   : > { %2662 = dma.hbm_to_vmem [thread:$0]  (!%p3378_p5), %s515_s0, 16, %s517_s24, [#allocation3]  }
  0x2d   : > { %s3234_s23 = smov [#allocation9]   ;;  %s592_s24 = sshll.u32 %s3601_s10, 4  ;;  %s593_s24 = int_to_ptr.hbm [resolvable:$true] %s592_s24 }
  0x2e   : > { %s540_s28 = sshll.u32 %s3632_s6, 4  ;;  %s568_s2 = sshll.u32 %s3234_s23, 4  ;;  %s541_s28 = int_to_ptr.hbm [resolvable:$true] %s540_s28  ;;  %s569_s2 = int_to_ptr.vmem [resolvable:$true] %s568_s2 }
  0x2f   : > { %s566_s4 = sshll.u32 %s3633_s8, 4  ;;  %s618_s5 = sshll.u32 %s3603_s12, 4  ;;  %s567_s4 = int_to_ptr.hbm [resolvable:$true] %s566_s4  ;;  %s619_s5 = int_to_ptr.hbm [resolvable:$true] %s618_s5 }
  0x30   : > { %2668 = dma.hbm_to_vmem [thread:$0]  (!%p3378_p5), %s541_s28, 1024, %s543_s29, [#allocation5], %s3232_s30, %s3232_s30, %s3233_s9  }
  0x31   : > { %2674 = dma.hbm_to_vmem [thread:$0]  (!%p3378_p5), %s567_s4, 1024, %s569_s2, [#allocation8], %s3232_s30, %s3232_s30, %s3233_s9  }
  0x32   : > { %s3235_s28 = smov [#allocation12]   ;;  %s3236_s21 = smov [#allocation15]  }
  0x33   : > { %s594_s29 = sshll.u32 %s3235_s28, 4  ;;  %s620_s23 = sshll.u32 %s3236_s21, 4  ;;  %s595_s29 = int_to_ptr.vmem [resolvable:$true] %s594_s29  ;;  %s621_s23 = int_to_ptr.vmem [resolvable:$true] %s620_s23 }
  0x34   : > { %2680 = dma.hbm_to_vmem [thread:$0]  (!%p3378_p5), %s593_s24, 1024, %s595_s29, [#allocation11], %s3232_s30, %s3232_s30, %s3233_s9  }
  0x35   : > { %s3237_s27 = smov 256   ;;  %s3238_s4 = smov 16  }
  0x36   : > { %2686 = dma.hbm_to_vmem [thread:$0]  (!%p3378_p5), %s619_s5, 4096, %s621_s23, [#allocation14], %s3237_s27, %s3237_s27, %s3238_s4  }
  0x37   : > { %s644_s26 = sshll.u32 %s3605_s14, 4  ;;  %s3239_s7 = smov [#allocation18]   ;;  %s645_s26 = int_to_ptr.hbm [resolvable:$true] %s644_s26 }
  0x38   : > { %s646_s28 = sshll.u32 %s3239_s7, 4  ;;  %s674_s24 = sshll.u32 %s3608_s17, 4  ;;  %s647_s28 = int_to_ptr.vmem [resolvable:$true] %s646_s28  ;;  %s675_s24 = int_to_ptr.hbm [resolvable:$true] %s674_s24 }
  0x39   : > { %2692 = dma.hbm_to_vmem [thread:$0]  (!%p3378_p5), %s645_s26, 1024, %s647_s28, [#allocation17], %s3232_s30, %s3232_s30, %s3233_s9  }
  0x3a   : > { %s3240_s5 = smov [#allocation21]   ;;  %s685_s27 = sshll.u32 %s3609_s18, 4  ;;  %s686_s27 = int_to_ptr.hbm [resolvable:$true] %s685_s27 }
  0x3b   : > { %s676_s29 = sshll.u32 %s3240_s5, 4  ;;  %s3241_s4 = smov [#allocation22]   ;;  %s677_s29 = int_to_ptr.vmem [resolvable:$true] %s676_s29 }
  0x3c   : > { %2698 = dma.hbm_to_vmem [thread:$0]  (!%p3378_p5), %s675_s24, 16, %s677_s29, [#allocation20]  }
  0x3d   : > { %s687_s2 = sshll.u32 %s3241_s4, 4  ;;  %724 = sbr.rel (%p3364_p3) target bundleno = 1002 (0x3ea), region = 100  ;;  %s688_s2 = int_to_ptr.vmem [resolvable:$true] %s687_s2 }
  0x3e   : > { %2701 = dma.hbm_to_vmem [thread:$0]  (!%p3378_p5), %s686_s27, 1024, %s688_s2, [#allocation23], %s3232_s30, %s3232_s30, %s3233_s9  }
  0x42   : > { %3189 = dma.done.wait (%p3360_p2), [#allocation3], 16  }
  0x43   : > { %3191 = vsyncadd (%p3360_p2), [#allocation3], 4294967280 }
  0x44   : > { %3193 = dma.done.wait (%p3360_p2), [#allocation5], 1040  }
  0x45   : > { %3195 = vsyncadd (%p3360_p2), [#allocation5], 4294966256 }
  0x46   : > { %3197 = dma.done.wait (%p3360_p2), [#allocation8], 1040  }
  0x47   : > { %3199 = vsyncadd (%p3360_p2), [#allocation8], 4294966256 }
  0x48   : > { %3201 = dma.done.wait (%p3360_p2), [#allocation11], 1040  }
  0x49   : > { %3203 = vsyncadd (%p3360_p2), [#allocation11], 4294966256 }
  0x4a   : > { %3205 = dma.done.wait (%p3360_p2), [#allocation14], 4112  }
  0x4b   : > { %3207 = vsyncadd (%p3360_p2), [#allocation14], 4294963184 }
  0x4c   : > { %3209 = dma.done.wait (%p3360_p2), [#allocation17], 1088  }
  0x4d   : > { %3211 = vsyncadd (%p3360_p2), [#allocation17], 4294966208 }
  0x4e   : > { %3213 = dma.done.wait (%p3360_p2), [#allocation20], 32  }
  0x4f   : > { %3215 = vsyncadd (%p3360_p2), [#allocation20], 4294967264 }
  0x50   : > { %3217 = dma.done.wait (%p3360_p2), [#allocation23], 1024  }
  0x51   : > { %3219 = vsyncadd (%p3360_p2), [#allocation23], 4294966272  ;;  %s3634_s3 = sld [smem:[#allocation34_spill]]  ;;  %v2538_v1 = vld [vmem:[#allocation9 + $0x38] sm:$0xff]  ;;  %v2537_v3 = vld [vmem:[#allocation9 + $0x30] sm:$0xff]  ;;  %s3636_s21 = sadd.s32 4294967295, %s3222_s1  }
  0x52   : > { %1223 = vmatpush.bf16.msra.mxu3 %v2538_v1  ;;  %v2536_v5 = vld [vmem:[#allocation9 + $0x28] sm:$0xff]  ;;  %s3635_s7 = sld [smem:[#allocation36_spill]]  ;;  %v2535_v8 = vld [vmem:[#allocation9 + $0x20] sm:$0xff]  ;;  %s2105_s23 = sshll.u32 %s3636_s21, 1  ;;  %v2534_v12 = vld [vmem:[#allocation9 + $0x18] sm:$0xff] }
  0x53   : > { %p854_p6 = scmp.lt.s32.totalorder %s2105_s23, 5  ;;  %v2533_v15 = vld [vmem:[#allocation9 + $0x10] sm:$0xff]  ;;  %v2532_v17 = vld [vmem:[#allocation9 + $0x8] sm:$0xff]  ;;  %v2531_v19 = vld [vmem:[#allocation9] sm:$0xff]  ;;  %s3637_s21 = sld [smem:[#allocation32_spill]] }
  0x54   : > { %s3638_s6 = sld [smem:[#allocation33_spill]]  ;;  %v2546_v20 = vld [vmem:[#allocation12 + $0x38] sm:$0xff]  ;;  %v2545_v23 = vld [vmem:[#allocation12 + $0x30] sm:$0xff]  ;;  %v2544_v24 = vld [vmem:[#allocation12 + $0x28] sm:$0xff] }
  0x55   : > { %s3640_s23 = smov (!%p854_p6, %s2105_s23), 5  ;;  %v2543_v26 = vld [vmem:[#allocation12 + $0x20] sm:$0xff]  ;;  %v2542_v28 = vld [vmem:[#allocation12 + $0x18] sm:$0xff]  ;;  %v2541_v30 = vld [vmem:[#allocation12 + $0x10] sm:$0xff] }
  0x56   : > { %1224 = vmatpush.bf16.msra.mxu3 %v2537_v3  ;;  %s2106_s26 = sshll.u32 %s3640_s23, 2  ;;  %v2540_v32 = vld [vmem:[#allocation12 + $0x8] sm:$0xff]  ;;  %v2539_v33 = vld [vmem:[#allocation12] sm:$0xff]  ;;  %v2529_v34 = vld [vmem:[#allocation6 + $0x38] sm:$0xff]  ;;  %s2110_s5 = sshll.u32 %s3640_s23, 3 }
  0x57   : > { %v2513_v0 = vld [vmem:[%s3634_s3 + $0x38] sm:$0xff]  ;;  %v2512_v2 = vld [vmem:[%s3634_s3 + $0x30] sm:$0xff]  ;;  %v2511_v4 = vld [vmem:[%s3634_s3 + $0x28] sm:$0xff]  ;;  %1125 = vmatpush.bf16.msra.mxu2 %v2529_v34  ;;  %s869_s2 = scalar_lea.vmem %s3611_s20, %s2110_s5 }
  0x58   : > { %947 = vmatpush.bf16.msra.mxu0 %v2513_v0  ;;  %v2521_v6 = vld [vmem:[%s3635_s7 + $0x38] sm:$0xff]  ;;  %v2510_v7 = vld [vmem:[%s3634_s3 + $0x20] sm:$0xff]  ;;  %v2520_v9 = vld [vmem:[%s3635_s7 + $0x30] sm:$0xff] }
  0x59   : > { %1036 = vmatpush.bf16.msra.mxu1 %v2521_v6  ;;  %v2519_v10 = vld [vmem:[%s3635_s7 + $0x28] sm:$0xff]  ;;  %v2509_v11 = vld [vmem:[%s3634_s3 + $0x18] sm:$0xff]  ;;  %v2518_v13 = vld [vmem:[%s3635_s7 + $0x20] sm:$0xff]  ;;  %s857_s27 = scalar_lea.vmem %s3637_s21, %s2106_s26 }
  0x5a   : > { %1225 = vmatpush.bf16.msra.mxu3 %v2536_v5  ;;  %v2508_v14 = vld [vmem:[%s3634_s3 + $0x10] sm:$0xff]  ;;  %v2507_v16 = vld [vmem:[%s3634_s3 + $0x8] sm:$0xff]  ;;  %v2506_v18 = vld [vmem:[%s3634_s3] sm:$0xff]  ;;  %s863_s8 = scalar_lea.vmem %s3638_s6, %s2106_s26 }
  0x5b   : > { %v2505_v21 = vld [vmem:[%s857_s27] sm:$0xff]  ;;  %v2517_v25 = vld [vmem:[%s3635_s7 + $0x18] sm:$0xff]  ;;  %v2516_v27 = vld [vmem:[%s3635_s7 + $0x10] sm:$0xff] }
  0x5c   : > { %948 = vmatpush.bf16.msra.mxu0 %v2512_v2  ;;  %v2530_v22 = vld [vmem:[%s863_s8] sm:$0xff]  ;;  %v2515_v29 = vld [vmem:[%s3635_s7 + $0x8] sm:$0xff]  ;;  %v2528_v35 = vld [vmem:[#allocation6 + $0x30] sm:$0xff] }
  0x5d   : > { %1037 = vmatpush.bf16.msra.mxu1 %v2520_v9  ;;  %v2514_v31 = vld [vmem:[%s3635_s7] sm:$0xff]  ;;  %v2393_v36 = vld [vmem:[#allocation15 + $0xe0] sm:$0xf]  ;;  %v2577_v37 = vld [vmem:[#allocation15 + $0xec] sm:$0xf0]  ;;  %1126 = vmatpush.bf16.msra.mxu2 %v2528_v35 }
  0x5e   : > { %1226 = vmatpush.bf16.msra.mxu3 %v2535_v8  ;;  %v2401_v38 = vld [vmem:[#allocation15 + $0xe8] sm:$0xf]  ;;  %v2578_v39 = vld [vmem:[#allocation15 + $0xf4] sm:$0xf0]  ;;  %v2394_v40 = vor.u32 %v2577_v37, %v2393_v36  ;;  %v2576_v42 = vld [vmem:[#allocation15 + $0xec] sm:$0xf] }
  0x5f   : > { %v2402_v41 = vor.u32 %v2578_v39, %v2401_v38  ;;  %v2403_v43 = vld [vmem:[#allocation15 + $0xf8] sm:$0xf0]  ;;  %v2377_v45 = vld [vmem:[#allocation15 + $0xc0] sm:$0xf]  ;;  %v2573_v46 = vld [vmem:[#allocation15 + $0xcc] sm:$0xf0] }
  0x60   : > { %949 = vmatpush.bf16.msra.mxu0 %v2511_v4  ;;  %v2406_v44 = vor.u32 %v2576_v42, %v2403_v43  ;;  %v2385_v47 = vld [vmem:[#allocation15 + $0xc8] sm:$0xf]  ;;  %v2378_v48 = vor.u32 %v2573_v46, %v2377_v45  ;;  %v2574_v49 = vld [vmem:[#allocation15 + $0xd4] sm:$0xf0]  ;;  %v2572_v50 = vld [vmem:[#allocation15 + $0xcc] sm:$0xf] }
  0x61   : > { %1038 = vmatpush.bf16.msra.mxu1 %v2519_v10  ;;  %v2387_v51 = vld [vmem:[#allocation15 + $0xd8] sm:$0xf0]  ;;  %v2527_v52 = vld [vmem:[#allocation6 + $0x28] sm:$0xff]  ;;  %v2386_v53 = vor.u32 %v2574_v49, %v2385_v47  ;;  %v2569_v56 = vld [vmem:[#allocation15 + $0xac] sm:$0xf0] }
  0x62   : > { %1227 = vmatpush.bf16.msra.mxu3 %v2534_v12  ;;  %v2390_v54 = vor.u32 %v2572_v50, %v2387_v51  ;;  %v2361_v55 = vld [vmem:[#allocation15 + $0xa0] sm:$0xf]  ;;  %v2369_v57 = vld [vmem:[#allocation15 + $0xa8] sm:$0xf]  ;;  %v2570_v58 = vld [vmem:[#allocation15 + $0xb4] sm:$0xf0]  ;;  %1127 = vmatpush.bf16.msra.mxu2 %v2527_v52 }
  0x63   : > { %v2568_v59 = vld [vmem:[#allocation15 + $0xac] sm:$0xf]  ;;  %v2371_v60 = vld [vmem:[#allocation15 + $0xb8] sm:$0xf0]  ;;  %v2362_v61 = vor.u32 %v2569_v56, %v2361_v55  ;;  %v2370_v62 = vor.u32 %v2570_v58, %v2369_v57  ;;  %v2756_v2 = vld [vmem:[#allocation2] ss:$0 sm:$0xff] }
  0x64   : > { %950 = vmatpush.bf16.msra.mxu0 %v2510_v7  ;;  %v2526_v0 = vld [vmem:[#allocation6 + $0x20] sm:$0xff]  ;;  %v2374_v1 = vor.u32 %v2568_v59, %v2371_v60  ;;  %v2525_v3 = vld [vmem:[#allocation6 + $0x18] sm:$0xff]  ;;  %v2524_v8 = vld [vmem:[#allocation6 + $0x10] sm:$0xff] }
  0x65   : > { %1039 = vmatpush.bf16.msra.mxu1 %v2518_v13  ;;  %v2757_v5 = vld [vmem:[#allocation10] ss:$0 sm:$0xff]  ;;  %v2523_v13 = vld [vmem:[#allocation6 + $0x8] sm:$0xff]  ;;  %v2379_v38 = vld [vmem:[#allocation15 + $0xd0] sm:$0xf0] }
  0x66   : > { %1228 = vmatpush.bf16.msra.mxu3 %v2533_v15  ;;  %1128 = vmatpush.bf16.msra.mxu2 %v2526_v0  ;;  %v2355_v34 = vld [vmem:[#allocation15 + $0x98] sm:$0xf0]  ;;  %v2571_v37 = vld [vmem:[#allocation15 + $0xc4] sm:$0xf]  ;;  %v2337_v42 = vld [vmem:[#allocation15 + $0x68] sm:$0xf] }
  0x67   : > { %v2382_v39 = vor.u32 %v2571_v37, %v2379_v38  ;;  %v2560_v45 = vld [vmem:[#allocation15 + $0x6c] sm:$0xf]  ;;  %v2339_v46 = vld [vmem:[#allocation15 + $0x78] sm:$0xf0]  ;;  %v2567_v49 = vld [vmem:[#allocation15 + $0xa4] sm:$0xf] }
  0x68   : > { %951 = vmatpush.bf16.msra.mxu0 %v2509_v11  ;;  %v2363_v50 = vld [vmem:[#allocation15 + $0xb0] sm:$0xf0]  ;;  %v2313_v52 = vld [vmem:[#allocation15 + $0x40] sm:$0xf]  ;;  %v2558_v56 = vld [vmem:[#allocation15 + $0x54] sm:$0xf0] }
  0x69   : > { %1040 = vmatpush.bf16.msra.mxu1 %v2517_v25  ;;  %v2575_v25 = vld [vmem:[#allocation15 + $0xe4] sm:$0xf]  ;;  %v2366_v51 = vor.u32 %v2567_v49, %v2363_v50  ;;  %v2556_v57 = vld [vmem:[#allocation15 + $0x4c] sm:$0xf]  ;;  %v2323_v58 = vld [vmem:[#allocation15 + $0x58] sm:$0xf0] }
  0x6a   : > { %1229 = vmatpush.bf16.msra.mxu3 %v2532_v17  ;;  %1129 = vmatpush.bf16.msra.mxu2 %v2525_v3  ;;  %v2326_v60 = vor.u32 %v2556_v57, %v2323_v58  ;;  %v2297_v0 = vld [vmem:[#allocation15 + $0x20] sm:$0xf]  ;;  %v2579_v57 = vld [vmem:[#allocation18] sm:$0xff]  ;;  %v2594_v58 = vld [vmem:[%s3607_s16 + $0x38] sm:$0xff] }
  0x6b   : > { %v2586_v50 = vld [vmem:[#allocation18 + $0x38] sm:$0xff] }
  0x6c   : > { %952 = vmatpush.bf16.msra.mxu0 %v2508_v14 }
  0x6d   : > { %1041 = vmatpush.bf16.msra.mxu1 %v2516_v27 }
  0x6e   : > { %1230 = vmatpush.bf16.msra.mxu3 %v2531_v19  ;;  %1130 = vmatpush.bf16.msra.mxu2 %v2524_v8 }
  0x70   : > { %953 = vmatpush.bf16.msra.mxu0 %v2507_v16 }
  0x71   : > { %1231 = vmatmul.bf16.vlgmr.msra.gmra.mxu3 %v2530_v22  ;;  %1042 = vmatpush.bf16.msra.mxu1 %v2515_v29  ;;  %v2565_v29 = vld [vmem:[#allocation15 + $0x8c] sm:$0xf0] }
  0x72   : > { %1563 = vmatpush.bf16.msrb.mxu3 %v2402_v41  ;;  %1131 = vmatpush.bf16.msra.mxu2 %v2523_v13  ;;  %v2561_v41 = vld [vmem:[#allocation15 + $0x6c] sm:$0xf0] }
  0x73   : > { %v2549_v13 = vld [vmem:[#allocation15 + $0xc] sm:$0xf0] }
  0x74   : > { %954 = vmatpush.bf16.msra.mxu0 %v2506_v18 }
  0x75   : > { %1043 = vmatpush.bf16.msra.mxu1 %v2514_v31 }
  0x76   : > { %1564 = vmatpush.bf16.msrb.mxu3 %v2386_v53  ;;  %v2557_v53 = vld [vmem:[#allocation15 + $0x4c] sm:$0xf0] }
  0x77   : > { %955 = vmatmul.bf16.vlgmr.msra.gmra.mxu0 %v2505_v21  ;;  %v2314_v55 = vor.u32 %v2557_v53, %v2313_v52  ;;  %v2584_v52 = vld [vmem:[#allocation18 + $0x28] sm:$0xff]  ;;  %v2583_v53 = vld [vmem:[#allocation18 + $0x20] sm:$0xff] }
  0x78   : > { %1312 = vmatpush.bf16.msrb.mxu0 %v2546_v20 }
  0x79   : > { %1535 = vmatpush.bf16.msrb.mxu1 %v2394_v40  ;;  %v2329_v40 = vld [vmem:[#allocation15 + $0x60] sm:$0xf] }
  0x7a   : > { %1565 = vmatpush.bf16.msrb.mxu3 %v2370_v62  ;;  %v2330_v43 = vor.u32 %v2561_v41, %v2329_v40  ;;  %v2347_v62 = vld [vmem:[#allocation15 + $0x90] sm:$0xf0] }
  0x7c   : > { %1313 = vmatpush.bf16.msrb.mxu0 %v2545_v23 }
  0x7d   : > { %1536 = vmatpush.bf16.msrb.mxu1 %v2378_v48  ;;  %v2342_v48 = vor.u32 %v2560_v45, %v2339_v46 }
  0x80   : > { %1314 = vmatpush.bf16.msrb.mxu0 %v2544_v24  ;;  %v2522_v24 = vld [vmem:[#allocation6] sm:$0xff] }
  0x81   : > { %1537 = vmatpush.bf16.msrb.mxu1 %v2362_v61  ;;  %1132 = vmatpush.bf16.msra.mxu2 %v2522_v24  ;;  %v2563_v61 = vld [vmem:[#allocation15 + $0x84] sm:$0xf] }
  0x82   : > { %v2551_v24 = vld [vmem:[#allocation15 + $0x24] sm:$0xf] }
  0x84   : > { %1315 = vmatpush.bf16.msrb.mxu0 %v2543_v26  ;;  %v2395_v26 = vld [vmem:[#allocation15 + $0xf0] sm:$0xf0] }
  0x85   : > { %v2398_v27 = vor.u32 %v2575_v25, %v2395_v26  ;;  %v2299_v25 = vld [vmem:[#allocation15 + $0x30] sm:$0xf0]  ;;  %v2547_v26 = vld [vmem:[#allocation15 + $0x4] sm:$0xf] }
  0x87   : > { %1549 = vmatpush.bf16.msrb.mxu2 %v2398_v27  ;;  %v2302_v27 = vor.u32 %v2551_v24, %v2299_v25  ;;  %v2592_v25 = vld [vmem:[%s3607_s16 + $0x28] sm:$0xff] }
  0x88   : > { %1316 = vmatpush.bf16.msrb.mxu0 %v2542_v28  ;;  %v2345_v28 = vld [vmem:[#allocation15 + $0x80] sm:$0xf] }
  0x89   : > { %v2346_v31 = vor.u32 %v2565_v29, %v2345_v28  ;;  %v2283_v28 = vld [vmem:[#allocation15 + $0x10] sm:$0xf0] }
  0x8a   : > { %v2286_v29 = vor.u32 %v2547_v26, %v2283_v28  ;;  %v2591_v26 = vld [vmem:[%s3607_s16 + $0x20] sm:$0xff]  ;;  %v2589_v28 = vld [vmem:[%s3607_s16 + $0x10] sm:$0xff] }
  0x8b   : > { %1538 = vmatpush.bf16.msrb.mxu1 %v2346_v31  ;;  %1550 = vmatpush.bf16.msrb.mxu2 %v2382_v39  ;;  %v2758_v31 = vld [vmem:[#allocation4] ss:$0 sm:$0xff] }
  0x8c   : > { %1317 = vmatpush.bf16.msrb.mxu0 %v2541_v30  ;;  %v2353_v30 = vld [vmem:[#allocation15 + $0x88] sm:$0xf] }
  0x8f   : > { %1539 = vmatpush.bf16.msrb.mxu1 %v2330_v43  ;;  %1551 = vmatpush.bf16.msrb.mxu2 %v2366_v51  ;;  %v2585_v51 = vld [vmem:[#allocation18 + $0x30] sm:$0xff] }
  0x90   : > { %1318 = vmatpush.bf16.msrb.mxu0 %v2540_v32  ;;  %v2566_v32 = vld [vmem:[#allocation15 + $0x94] sm:$0xf0] }
  0x91   : > { %v2354_v35 = vor.u32 %v2566_v32, %v2353_v30 }
  0x93   : > { %1566 = vmatpush.bf16.msrb.mxu3 %v2354_v35  ;;  %1540 = vmatpush.bf16.msrb.mxu1 %v2314_v55  ;;  %v2581_v55 = vld [vmem:[#allocation18 + $0x10] sm:$0xff] }
  0x94   : > { %1319 = vmatpush.bf16.msrb.mxu0 %v2539_v33  ;;  %v2564_v33 = vld [vmem:[#allocation15 + $0x8c] sm:$0xf] }
  0x95   : > { %v2358_v36 = vor.u32 %v2564_v33, %v2355_v34  ;;  %v2759_v34 = vld [vmem:[#allocation13] ss:$0 sm:$0xff] }
  0x98   : > { %1577 = vmatpush.bf16.msra.mxu0 %v2406_v44  ;;  %v2562_v44 = vld [vmem:[#allocation15 + $0x74] sm:$0xf0] }
  0x99   : > { %v2338_v47 = vor.u32 %v2562_v44, %v2337_v42 }
  0x9b   : > { %1567 = vmatpush.bf16.msrb.mxu3 %v2338_v47 }
  0x9c   : > { %1578 = vmatpush.bf16.msra.mxu0 %v2390_v54  ;;  %v2321_v54 = vld [vmem:[#allocation15 + $0x48] sm:$0xf] }
  0x9d   : > { %v2322_v59 = vor.u32 %v2558_v56, %v2321_v54  ;;  %v2582_v54 = vld [vmem:[#allocation18 + $0x18] sm:$0xff]  ;;  %v2580_v56 = vld [vmem:[#allocation18 + $0x8] sm:$0xff] }
  0x9f   : > { %1568 = vmatpush.bf16.msrb.mxu3 %v2322_v59 }
  0xa0   : > { %1579 = vmatpush.bf16.msra.mxu0 %v2374_v1  ;;  %v2553_v1 = vld [vmem:[#allocation15 + $0x2c] sm:$0xf0] }
  0xa1   : > { %v2298_v3 = vor.u32 %v2553_v1, %v2297_v0 }
  0xa3   : > { %1541 = vmatpush.bf16.msrb.mxu1 %v2298_v3 }
  0xa4   : > { %1580 = vmatpush.bf16.msra.mxu0 %v2358_v36 }
  0xa8   : > { %1581 = vmatpush.bf16.msra.mxu0 %v2342_v48 }
  0xac   : > { %1582 = vmatpush.bf16.msra.mxu0 %v2326_v60  ;;  %v2593_v60 = vld [vmem:[%s3607_s16 + $0x30] sm:$0xff] }
  0xf4   : > { %v956_v63 = vpop.f32.mrf.mxu0  ;;  %v1232_v6 = vpop.f32.mrf.mxu3 }
  0xf5   : > { %v957_v4 = vadd.f32 %v2756_v2, %v956_v63  ;;  %v1233_v10 = vadd.f32 %v2757_v5, %v1232_v6  ;;  %v2350_v63 = vor.u32 %v2563_v61, %v2347_v62  ;;  %v2307_v6 = vld [vmem:[#allocation15 + $0x38] sm:$0xf0]  ;;  %v2760_v61 = vld [vmem:[#allocation7] ss:$0 sm:$0xff] }
  0xf7   : > { %v963_v9 = vmul.f32 0.2, %v957_v4  ;;  %vm961_vm0 = vcmp.gt.f32.partialorder %v957_v4, 0.0  ;;  %v1239_v14 = vmul.f32 0.2, %v1233_v10  ;;  %vm1237_vm2 = vcmp.gt.f32.partialorder %v1233_v10, 0.0  ;;  %1552 = vmatpush.bf16.msrb.mxu2 %v2350_v63 }
  0xf9   : > { %v965_v15 = vsel %vm961_vm0, %v957_v4, %v963_v9  ;;  %v1241_v21 = vsel %vm1237_vm2, %v1233_v10, %v1239_v14  ;;  %v2554_v4 = vld [vmem:[#allocation15 + $0x34] sm:$0xf0]  ;;  %v2559_v9 = vld [vmem:[#allocation15 + $0x64] sm:$0xf]  ;;  %v2331_v10 = vld [vmem:[#allocation15 + $0x70] sm:$0xf0] }
  0xfa   : > { %v2289_v14 = vld [vmem:[#allocation15 + $0x8] sm:$0xf] }
  0xfc   : > { %v958_v7 = vpop.f32.mrf.mxu0  ;;  %v1234_v17 = vpop.f32.mrf.mxu3 }
  0xfd   : > { %v959_v11 = vadd.f32 %v2756_v2, %v958_v7  ;;  %v1235_v19 = vadd.f32 %v2757_v5, %v1234_v17  ;;  %v2305_v2 = vld [vmem:[#allocation15 + $0x28] sm:$0xf]  ;;  %v2552_v5 = vld [vmem:[#allocation15 + $0x2c] sm:$0xf] }
  0xfe   : > { %v2306_v7 = vor.u32 %v2554_v4, %v2305_v2  ;;  %v2310_v8 = vor.u32 %v2552_v5, %v2307_v6  ;;  %v2548_v17 = vld [vmem:[#allocation15 + $0xc] sm:$0xf]  ;;  %v3557_v6 = vld [vmem:[#allocation16] sm:$0xf] }
  0xff   : > { %v964_v12 = vmul.f32 0.2, %v959_v11  ;;  %vm962_vm1 = vcmp.gt.f32.partialorder %v959_v11, 0.0  ;;  %vm1238_vm3 = vcmp.gt.f32.partialorder %v1235_v19, 0.0  ;;  %v1240_v20 = vmul.f32 0.2, %v1235_v19 }
 0x100   : > { %1569 = vmatpush.bf16.msrb.mxu3 %v2306_v7  ;;  %1583 = vmatpush.bf16.msra.mxu0 %v2310_v8 }
 0x101   : > { %v966_v16 = vsel %vm962_vm1, %v959_v11, %v964_v12  ;;  %v1242_v22 = vsel %vm1238_vm3, %v1235_v19, %v1240_v20  ;;  %v2334_v11 = vor.u32 %v2559_v9, %v2331_v10  ;;  %v2281_v12 = vld [vmem:[#allocation15] sm:$0xf]  ;;  %v1367_v10 = vperm.slane %v3557_v6, 0 }
 0x102   : > { %v967_v18 = vpack.c.bf16 %v966_v16, %v965_v15  ;;  %v1243_v23 = vpack.c.bf16 %v1242_v22, %v1241_v21  ;;  %v2282_v15 = vor.u32 %v2549_v13, %v2281_v12  ;;  %v2550_v16 = vld [vmem:[#allocation15 + $0x14] sm:$0xf0]  ;;  %v2555_v21 = vld [vmem:[#allocation15 + $0x44] sm:$0xf]  ;;  %v2315_v22 = vld [vmem:[#allocation15 + $0x50] sm:$0xf0] }
 0x103   : > { %1553 = vmatpush.bf16.msrb.mxu2 %v2334_v11  ;;  %v2290_v19 = vor.u32 %v2550_v16, %v2289_v14  ;;  %v1368_v11 = vperm.slane %v3557_v6, 1 }
 0x104   : > { %1044 = vmatmul.bf16.vlgmr.msra.gmra.mxu1 %v967_v18  ;;  %1320 = vmatmul.bf16.vlgmr.msrb.gmra.mxu0 %v1243_v23  ;;  %v2291_v18 = vld [vmem:[#allocation15 + $0x18] sm:$0xf0]  ;;  %v2318_v23 = vor.u32 %v2555_v21, %v2315_v22 }
 0x105   : > { %v2294_v20 = vor.u32 %v2548_v17, %v2291_v18  ;;  %1542 = vmatpush.bf16.msrb.mxu1 %v2282_v15  ;;  %1570 = vmatpush.bf16.msrb.mxu3 %v2290_v19 }
 0x107   : > { %1584 = vmatpush.bf16.msra.mxu0 %v2294_v20  ;;  %1554 = vmatpush.bf16.msrb.mxu2 %v2318_v23 }
 0x109   : > { %1666 = vmatpush.bf16.msra.mxu1 %v2586_v50  ;;  %v1370_v50 = vperm.slane %v3557_v6, 3 }
 0x10b   : > { %1555 = vmatpush.bf16.msrb.mxu2 %v2302_v27  ;;  %v2590_v27 = vld [vmem:[%s3607_s16 + $0x18] sm:$0xff] }
 0x10d   : > { %1667 = vmatpush.bf16.msra.mxu1 %v2585_v51 }
 0x10f   : > { %1556 = vmatpush.bf16.msrb.mxu2 %v2286_v29  ;;  %v2588_v29 = vld [vmem:[%s3607_s16 + $0x8] sm:$0xff] }
 0x111   : > { %1668 = vmatpush.bf16.msra.mxu1 %v2584_v52 }
 0x115   : > { %1669 = vmatpush.bf16.msra.mxu1 %v2583_v53 }
 0x119   : > { %1670 = vmatpush.bf16.msra.mxu1 %v2582_v54 }
 0x11d   : > { %1671 = vmatpush.bf16.msra.mxu1 %v2581_v55 }
 0x121   : > { %1672 = vmatpush.bf16.msra.mxu1 %v2580_v56 }
 0x125   : > { %1673 = vmatpush.bf16.msra.mxu1 %v2579_v57 }
 0x181   : > { %v1045_v30 = vpop.f32.mrf.mxu1  ;;  %v1321_v33 = vpop.f32.mrf.mxu0 }
 0x182   : > { %v1046_v32 = vadd.f32 %v2758_v31, %v1045_v30  ;;  %v1322_v38 = vadd.f32 %v2759_v34, %v1321_v33  ;;  %v2587_v30 = vld [vmem:[%s3607_s16] sm:$0xff]  ;;  %v2761_v33 = vld [vmem:[#allocation19] ss:$0 sm:$0xff] }
 0x184   : > { %v1052_v36 = vmul.f32 0.2, %v1046_v32  ;;  %vm1050_vm4 = vcmp.gt.f32.partialorder %v1046_v32, 0.0  ;;  %v1328_v44 = vmul.f32 0.2, %v1322_v38  ;;  %vm1326_vm6 = vcmp.gt.f32.partialorder %v1322_v38, 0.0 }
 0x186   : > { %v1054_v40 = vsel %vm1050_vm4, %v1046_v32, %v1052_v36  ;;  %v1330_v47 = vsel %vm1326_vm6, %v1322_v38, %v1328_v44  ;;  %v2601_v32 = vld [vmem:[#allocation22 + $0x30] sm:$0xff] }
 0x189   : > { %v1047_v35 = vpop.f32.mrf.mxu1  ;;  %v1323_v42 = vpop.f32.mrf.mxu0 }
 0x18a   : > { %v1048_v37 = vadd.f32 %v2758_v31, %v1047_v35  ;;  %v1324_v45 = vadd.f32 %v2759_v34, %v1323_v42  ;;  %v2602_v31 = vld [vmem:[#allocation22 + $0x38] sm:$0xff]  ;;  %v2600_v34 = vld [vmem:[#allocation22 + $0x28] sm:$0xff] }
 0x18b   : > { %1852 = vmatpush.bf16.msra.mxu3 %v2602_v31 }
 0x18c   : > { %v1053_v39 = vmul.f32 0.2, %v1048_v37  ;;  %vm1051_vm5 = vcmp.gt.f32.partialorder %v1048_v37, 0.0  ;;  %vm1327_vm7 = vcmp.gt.f32.partialorder %v1324_v45, 0.0  ;;  %v1329_v46 = vmul.f32 0.2, %v1324_v45 }
 0x18e   : > { %v1055_v41 = vsel %vm1051_vm5, %v1048_v37, %v1053_v39  ;;  %v1331_v48 = vsel %vm1327_vm7, %v1324_v45, %v1329_v46  ;;  %v2599_v37 = vld [vmem:[#allocation22 + $0x20] sm:$0xff]  ;;  %v1369_v45 = vperm.slane %v3557_v6, 2 }
 0x18f   : > { %v1056_v43 = vpack.c.bf16 %v1055_v41, %v1054_v40  ;;  %v1332_v49 = vpack.c.bf16 %v1331_v48, %v1330_v47  ;;  %1853 = vmatpush.bf16.msra.mxu3 %v2601_v32 }
 0x191   : > { %1133 = vmatmul.bf16.vlgmr.msra.gmra.mxu2 %v1056_v43  ;;  %1543 = vmatmul.bf16.vlgmr.msrb.gmra.mxu1 %v1332_v49 }
 0x192   : > { %1571 = vmatmul.bf16.vlgmr.msrb.gmra.mxu3 %v1332_v49  ;;  %1585 = vmatmul.bf16.vlgmr.msra.gmra.mxu0 %v1332_v49 }
 0x193   : > { %1763 = vmatpush.bf16.msra.mxu2 %v2594_v58  ;;  %1854 = vmatpush.bf16.msra.mxu3 %v2600_v34 }
 0x197   : > { %1764 = vmatpush.bf16.msra.mxu2 %v2593_v60  ;;  %1855 = vmatpush.bf16.msra.mxu3 %v2599_v37 }
 0x19b   : > { %1765 = vmatpush.bf16.msra.mxu2 %v2592_v25 }
 0x19f   : > { %1766 = vmatpush.bf16.msra.mxu2 %v2591_v26 }
 0x1a1   : > { %1557 = vmatmul.bf16.vlgmr.msrb.gmra.mxu2 %v1332_v49 }
 0x1a3   : > { %1767 = vmatpush.bf16.msra.mxu2 %v2590_v27 }
 0x1a7   : > { %1768 = vmatpush.bf16.msra.mxu2 %v2589_v28 }
 0x1ab   : > { %1769 = vmatpush.bf16.msra.mxu2 %v2588_v29 }
 0x1af   : > { %1770 = vmatpush.bf16.msra.mxu2 %v2587_v30 }
 0x20e   : > { %v1544_v2 = vpop.f32.mrf.mxu1 }
 0x20f   : > { %v1545_v15 = vadd.f32 %v1544_v2, %v1367_v10  ;;  %v1586_v40 = vpop.f32.mrf.mxu0  ;;  %v2595_v2 = vld [vmem:[#allocation22] sm:$0xff] }
 0x210   : > { %v1587_v57 = vadd.f32 %v1586_v40, %v1370_v50 }
 0x214   : > { %v1134_v59 = vpop.f32.mrf.mxu2 }
 0x215   : > { %v1135_v62 = vadd.f32 %v2760_v61, %v1134_v59  ;;  %v1572_v38 = vpop.f32.mrf.mxu3 }
 0x216   : > { %v1546_v12 = vpop.f32.mrf.mxu1  ;;  %v1573_v51 = vadd.f32 %v1572_v38, %v1369_v45 }
 0x217   : > { %v1141_v1 = vmul.f32 0.2, %v1135_v62  ;;  %vm1139_vm8 = vcmp.gt.f32.partialorder %v1135_v62, 0.0  ;;  %v1547_v16 = vadd.f32 %v1546_v12, %v1367_v10  ;;  %v1588_v53 = vpop.f32.mrf.mxu0 }
 0x218   : > { %v1589_v58 = vadd.f32 %v1588_v53, %v1370_v50 }
 0x219   : > { %v1143_v4 = vsel %vm1139_vm8, %v1135_v62, %v1141_v1  ;;  %v2596_v1 = vld [vmem:[#allocation22 + $0x8] sm:$0xff] }
 0x21a   : > { %v1145_v8 = vpack.c.bf16 %v1143_v4, %v1143_v4  ;;  %v2762_v4 = vld [vmem:[#allocation21] ss:$0 sm:$0xff] }
 0x21c   : > { %v1136_v63 = vpop.f32.mrf.mxu2  ;;  %v1591_v13 = vunpack.c.l.bf16 %v1145_v8 }
 0x21d   : > { %v1137_v0 = vadd.f32 %v2760_v61, %v1136_v63  ;;  %v1574_v48 = vpop.f32.mrf.mxu3  ;;  %v2598_v63 = vld [vmem:[#allocation22 + $0x18] sm:$0xff] }
 0x21e   : > { %v1593_v19 = vmul.f32 %v1591_v13, %v1545_v15  ;;  %v1575_v54 = vadd.f32 %v1574_v48, %v1369_v45  ;;  %1856 = vmatpush.bf16.msra.mxu3 %v2598_v63  ;;  %v2763_v13 = vld [vmem:[%s3610_s19] ss:$0 sm:$0xff] }
 0x21f   : > { %vm1140_vm9 = vcmp.gt.f32.partialorder %v1137_v0, 0.0  ;;  %v1142_v3 = vmul.f32 0.2, %v1137_v0 }
 0x221   : > { %v1144_v5 = vsel %vm1140_vm9, %v1137_v0, %v1142_v3  ;;  %v2597_v0 = vld [vmem:[#allocation22 + $0x10] sm:$0xff] }
 0x222   : > { %v1146_v9 = vpack.c.bf16 %v1144_v5, %v1144_v5  ;;  %1857 = vmatpush.bf16.msra.mxu3 %v2597_v0 }
 0x224   : > { %v1558_v7 = vpop.f32.mrf.mxu2  ;;  %v1592_v14 = vunpack.c.l.bf16 %v1146_v9 }
 0x225   : > { %v1559_v17 = vadd.f32 %v1558_v7, %v1368_v11 }
 0x226   : > { %v1594_v20 = vmul.f32 %v1592_v14, %v1547_v16  ;;  %1858 = vmatpush.bf16.msra.mxu3 %v2596_v1 }
 0x227   : > { %v1595_v22 = vadd.f32 %v1593_v19, %v1559_v17 }
 0x22a   : > { %1859 = vmatpush.bf16.msra.mxu3 %v2595_v2 }
 0x22c   : > { %v1560_v18 = vpop.f32.mrf.mxu2 }
 0x22d   : > { %v1561_v21 = vadd.f32 %v1560_v18, %v1368_v11 }
 0x22f   : > { %v1596_v23 = vadd.f32 %v1594_v20, %v1561_v21 }
 0x231   : > { %v1597_v24 = vpack.c.bf16 %v1596_v23, %v1595_v22 }
 0x233   : > { %1674 = vmatmul.bf16.vlgmr.msra.gmra.mxu1 %v1597_v24 }
 0x2b0   : > { %v1675_v35 = vpop.f32.mrf.mxu1 }
 0x2b1   : > { %v1676_v36 = vadd.f32 %v2761_v33, %v1675_v35 }
 0x2b3   : > { %vm1680_vm10 = vcmp.gt.f32.partialorder %v1676_v36, 0.0  ;;  %v1682_v39 = vmul.f32 0.2, %v1676_v36 }
 0x2b5   : > { %v1684_v41 = vsel %vm1680_vm10, %v1676_v36, %v1682_v39 }
 0x2b6   : > { %v1686_v42 = vpack.c.bf16 %v1684_v41, %v1684_v41 }
 0x2b8   : > { %v1677_v43 = vpop.f32.mrf.mxu1  ;;  %v1688_v47 = vunpack.c.l.bf16 %v1686_v42 }
 0x2b9   : > { %v1678_v44 = vadd.f32 %v2761_v33, %v1677_v43 }
 0x2ba   : > { %v1690_v55 = vmul.f32 %v1688_v47, %v1573_v51 }
 0x2bb   : > { %vm1681_vm11 = vcmp.gt.f32.partialorder %v1678_v44, 0.0  ;;  %v1683_v46 = vmul.f32 0.2, %v1678_v44 }
 0x2bc   : > { %v1692_v60 = vadd.f32 %v1690_v55, %v1587_v57 }
 0x2bd   : > { %v1685_v49 = vsel %vm1681_vm11, %v1678_v44, %v1683_v46 }
 0x2be   : > { %v1687_v52 = vpack.c.bf16 %v1685_v49, %v1685_v49 }
 0x2c0   : > { %v1689_v56 = vunpack.c.l.bf16 %v1687_v52 }
 0x2c2   : > { %v1691_v59 = vmul.f32 %v1689_v56, %v1575_v54 }
 0x2c4   : > { %v1693_v61 = vadd.f32 %v1691_v59, %v1589_v58 }
 0x2c6   : > { %v1694_v62 = vpack.c.bf16 %v1693_v61, %v1692_v60 }
 0x2c8   : > { %1771 = vmatmul.bf16.vlgmr.msra.gmra.mxu2 %v1694_v62 }
 0x34b   : > { %v1772_v3 = vpop.f32.mrf.mxu2 }
 0x34c   : > { %v1773_v5 = vadd.f32 %v2762_v4, %v1772_v3 }
 0x34e   : > { %v1779_v7 = vmul.f32 0.2, %v1773_v5  ;;  %vm1777_vm12 = vcmp.gt.f32.partialorder %v1773_v5, 0.0 }
 0x350   : > { %v1781_v10 = vsel %vm1777_vm12, %v1773_v5, %v1779_v7 }
 0x353   : > { %v1774_v6 = vpop.f32.mrf.mxu2 }
 0x354   : > { %v1775_v8 = vadd.f32 %v2762_v4, %v1774_v6 }
 0x356   : > { %vm1778_vm13 = vcmp.gt.f32.partialorder %v1775_v8, 0.0  ;;  %v1780_v9 = vmul.f32 0.2, %v1775_v8 }
 0x358   : > { %v1782_v11 = vsel %vm1778_vm13, %v1775_v8, %v1780_v9 }
 0x359   : > { %v1783_v12 = vpack.c.bf16 %v1782_v11, %v1781_v10 }
 0x35b   : > { %1860 = vmatmul.bf16.vlgmr.msra.gmra.mxu3 %v1783_v12 }
 0x3de   : > { %v1861_v14 = vpop.f32.mrf.mxu3 }
 0x3df   : > { %v1862_v15 = vadd.f32 %v2763_v13, %v1861_v14 }
 0x3e1   : > { %1866 = vst [vmem:[%s869_s2] sm:$0xff] %v1862_v15 }
 0x3e6   : > { %v1863_v16 = vpop.f32.mrf.mxu3 }
 0x3e7   : > { %v1864_v17 = vadd.f32 %v2763_v13, %v1863_v16 }
 0x3e9   : > { %1867 = vst [vmem:[%s869_s2 + $0x8] sm:$0xff] %v1864_v17 }
 0x3ea PF: > { %s38_s1 = sadd.s32 1, %s3222_s1  }
 0x3eb   : > { %p35_p7 = scmp.ge.s32.totalorder %s38_s1, 5  }
 0x3ed   :  { %37 = sbr.rel (!%p35_p7) target bundleno = 19 (0x13), region = 190 }
 0x3f2   :  { %1890 = vsyncpa [#allocation3], 1 }
 0x3f3   :  { %1892 = vsyncpa [#allocation3 + $0x1], 1 }
 0x3f4   :  { %1893 = vsyncpa [#allocation5], 1 }
 0x3f5   :  { %1894 = vsyncpa [#allocation8], 1 }
 0x3f6   :  { %1895 = vsyncpa [#allocation11], 1 }
 0x3f7   :  { %1896 = vsyncpa [#allocation14], 1 }
 0x3f8   :  { %1897 = vsyncpa [#allocation17], 1 }
 0x3f9   :  { %1898 = vsyncpa [#allocation20], 1 }
 0x3fa   :  { %1899 = vsyncpa [#allocation23], 1 }

</bundles_post_ra>
